<compile_context>
chip_gen: v7x
topology: tpu7x:2x2x1
jax: 0.10.0
libtpu: 0.0.40
codegen_flags: <defaults>
</compile_context>

<pallas_src>
import functools
import math

import jax
import jax.numpy as jnp
from jax.experimental import pallas as pl
from jax.experimental.pallas import tpu as pltpu

BN_EPS = 1e-5
TM_MAX = 256          # target output rows (Ho*Wo elements) per M-tile
PER_TAP_MIN_CIN = 128  # switch from tap-folding to per-tap accumulation at this depth


# ----------------------------------------------------------------------------
# VMEM budget (chip aware)
# ----------------------------------------------------------------------------
@functools.lru_cache(maxsize=None)
def _vmem_limit_bytes():
    """~96 MiB on v5e/v6e (128 MiB VMEM), ~48 MiB on v7x (64 MiB/TC); safe fallback 48 MiB."""
    try:
        cap = int(pltpu.get_tpu_info().vmem_capacity_bytes)
        return max(min(cap * 3 // 4, 100 * 1024 * 1024), 32 * 1024 * 1024)
    except Exception:
        return 48 * 1024 * 1024


# ----------------------------------------------------------------------------
# Tiling helpers
# ----------------------------------------------------------------------------
def _largest_tile(total, max_tile, mult):
    """Largest divisor of `total` that is a multiple of `mult` and <= max_tile, else `total`."""
    best = None
    for t in range(mult, max_tile + 1, mult):
        if total % t == 0:
            best = t
    return total if best is None else best


def _pick_th(Ho, Wo, tm_max=TM_MAX):
    """Pick TH (output rows per M-tile): divisor of Ho, lane-legal (TH*Wo % 8 == 0 or full),
    preferring the largest tile that fits the budget, else the smallest legal one."""
    # TODO(synk): for prime/odd production extents, pad M up to a tile multiple and mask
    # instead of falling back to the full extent.
    legal = [th for th in range(1, Ho + 1)
             if Ho % th == 0 and ((th * Wo) % 8 == 0 or th == Ho)]
    fitting = [th for th in legal if th * Wo <= tm_max]
    if fitting:
        return max(fitting)
    return min(legal)


def _pick_tc(Cout):
    if Cout % 256 == 0:
        return 256
    if Cout % 128 == 0:
        return 128
    return Cout


def _phase_split(xp, stride):
    """(N, Hp, Wp, C) -> (N, S*S, ceil(Hp/S), ceil(Wp/S), C).

    Phase p = a*S + b holds xp[:, a::S, b::S, :], so a stride-S conv tap (kh, kw) becomes a
    *contiguous* shifted view of phase ((kh % S)*S + (kw % S)) at offset (kh//S, kw//S)."""
    if stride == 1:
        return xp[:, None]
    N, Hp, Wp, C = xp.shape
    S = stride
    Hq = -(-Hp // S) * S
    Wq = -(-Wp // S) * S
    if (Hq, Wq) != (Hp, Wp):
        xp = jnp.pad(xp, ((0, 0), (0, Hq - Hp), (0, Wq - Wp), (0, 0)))
    x = xp.reshape(N, Hq // S, S, Wq // S, S, C)
    x = jnp.transpose(x, (0, 2, 4, 1, 3, 5))          # (N, S, S, Hq//S, Wq//S, C)
    return x.reshape(N, S * S, Hq // S, Wq // S, C)


# ----------------------------------------------------------------------------
# Pallas kernels
# ----------------------------------------------------------------------------
def _conv_bn_kernel(*refs, KH, KW, S, TH, Wo, Cin, relu, has_sc, has_res, merge, per_tap):
    """Fused conv + bias (BN scale pre-folded into weights) (+ identity residual) (+ ReLU),
    optionally also emitting the 1x1 projection shortcut (+ its BN) as a second output,
    for one (batch, Cout-tile, M-tile) grid cell.

    Blocks:
      x    : (1, S*S, Hp2, Wp2, Cin)  phase-split zero-padded input, bf16
      w    : (KH*KW*Cin, TC)          conv weight (BN scale folded, taps folded), bf16
      b    : (1, TC)                  BN bias, f32
      [ws, bs]                        projection-shortcut 1x1 weight (Cin, TC) bf16 /
                                      bias (1, TC) f32 (center tap reused as its input)
      [r]                             residual (1, TM, TC) bf16 added before ReLU
      out  : (1, TM, TC)              bf16
      [sc] : (1, TM, TC)              bf16 projection-shortcut output
    """
    idx = 0
    x_ref = refs[idx]; idx += 1
    w_ref = refs[idx]; idx += 1
    b_ref = refs[idx]; idx += 1
    if has_sc:
        ws_ref = refs[idx]; bs_ref = refs[idx + 1]; idx += 2
    if has_res:
        r_ref = refs[idx]; idx += 1
    o_ref = refs[idx]; idx += 1
    if has_sc:
        sc_ref = refs[idx]; idx += 1

    m = pl.program_id(2)                       # M-tiles on the innermost grid axis
    row0 = m * TH                              # first output row (ho) of this M-tile
    if TH & (TH - 1) == 0:                     # aligned-load hint when TH is a power of 2
        row0 = pl.multiple_of(row0, TH)

    # Gather the KH*KW shifted views straight out of the VMEM-resident padded input
    # (no HBM im2col).  Each view is (TH, Wo, Cin).
    views = []
    for kh in range(KH):
        for kw in range(KW):
            ph = (kh % S) * S + (kw % S)
            v = x_ref[0, ph, pl.ds(row0 + kh // S, TH), kw // S: kw // S + Wo, :]
            views.append(v)
    # Center tap == x[ho*S, wo*S] (3x3, pad 1): reused as the 1x1 stride-S shortcut input.
    center = views[(KH // 2) * KW + (KW // 2)] if has_sc else None

    bv = b_ref[...]
    TM = TH * Wo

    if merge:
        # --- single MXU contraction per grid cell, single dense store ---
        if per_tap:
            # Deep input: accumulate KH*KW depth-Cin matmuls (no lane-axis repack).
            y = None
            for t, v in enumerate(views):
                d = jnp.dot(v.reshape(TM, Cin), w_ref[t * Cin:(t + 1) * Cin, :],
                            preferred_element_type=jnp.float32)
                y = d if y is None else y + d
        else:
            # Shallow input: fold taps into the contraction depth (KH*KW*Cin).
            pat = views[0] if len(views) == 1 else jnp.concatenate(views, axis=2)
            y = jnp.dot(pat.reshape(TM, KH * KW * Cin), w_ref[...],
                        preferred_element_type=jnp.float32)
        y = y + bv
        if has_res:
            y = y + r_ref[0].astype(jnp.float32)
        if relu:
            y = jnp.maximum(y, 0.0)
        o_ref[0] = y.astype(o_ref.dtype)
        if has_sc:
            ysc = jnp.dot(center.reshape(TM, Cin), ws_ref[...],
                          preferred_element_type=jnp.float32) + bs_ref[...]
            sc_ref[0] = ysc.astype(sc_ref.dtype)
    else:
        # Fallback for tiny tiles where Wo is not sublane aligned (small spatial layers).
        pat = views[0] if len(views) == 1 else jnp.concatenate(views, axis=2)
        wv = w_ref[...]
        for r in range(TH):
            lo = r * Wo
            y = jnp.dot(pat[r], wv, preferred_element_type=jnp.float32) + bv
            if has_res:
                y = y + r_ref[0, lo:lo + Wo, :].astype(jnp.float32)
            if relu:
                y = jnp.maximum(y, 0.0)
            o_ref[0, lo:lo + Wo, :] = y.astype(o_ref.dtype)
            if has_sc:
                ysc = jnp.dot(center[r], ws_ref[...],
                              preferred_element_type=jnp.float32) + bs_ref[...]
                sc_ref[0, lo:lo + Wo, :] = ysc.astype(sc_ref.dtype)


def _stats_pool_kernel(x_ref, o_ref, acc_ref, *, T):
    """Single-pass temporal statistics pooling over frames (unbiased std).

    x_ref : (1, H, TW, C) bf16 frame tile ; o_ref : (1, 2, H, C) f32 [mean, std]
    acc_ref: (2, H, C) f32 scratch holding running sum / sum-of-squares.
    """
    t = pl.program_id(1)

    @pl.when(t == 0)
    def _():
        acc_ref[...] = jnp.zeros_like(acc_ref)

    x = x_ref[0].astype(jnp.float32)            # (H, TW, C)
    acc_ref[0] += jnp.sum(x, axis=1)
    acc_ref[1] += jnp.sum(x * x, axis=1)

    @pl.when(t == pl.num_programs(1) - 1)
    def _():
        s1 = acc_ref[0]
        s2 = acc_ref[1]
        mean = s1 * (1.0 / T)
        # unbiased variance (correction=1); f32 sum/sumsq accumulators (see module notes).
        var = (s2 - T * mean * mean) * (1.0 / (T - 1))
        std = jnp.sqrt(jnp.maximum(var, 0.0))
        o_ref[0, 0] = mean
        o_ref[0, 1] = std


def _head_kernel(stats_ref, w1_ref, b1_ref, w2_ref, b2_ref, a_ref, b_ref, *, bn_scale):
    """seg_1 -> ReLU -> BatchNorm1d(eval, affine=False, default stats) -> seg_2."""
    a = jnp.dot(stats_ref[...], w1_ref[...], preferred_element_type=jnp.float32) + b1_ref[...]
    a_ref[...] = a
    h = jnp.maximum(a, 0.0) * bn_scale
    b_ref[...] = jnp.dot(h, w2_ref[...], preferred_element_type=jnp.float32) + b2_ref[...]


# ----------------------------------------------------------------------------
# Wrappers (glue in plain JAX, compute in Pallas)
# ----------------------------------------------------------------------------
def conv_bn(x, w, scale, bias, *, stride, relu, residual=None, sc=None):
    """x: (N, H, W, Cin) NHWC; w: (KH, KW, Cin, Cout). Returns (N, Ho, Wo, Cout) bf16.

    residual: (N, Ho, Wo, Cout) residual tensor added before the ReLU.
    sc: (sc_w (1,1,Cin,Cout), sc_scale, sc_bias) -> additionally returns the projection
        shortcut bn_sc(conv1x1_stride_S(x)) as a second (N, Ho, Wo, Cout) output, computed
        from the center tap view already resident in VMEM (no extra HBM read of x).
    """
    N, H, W, Cin = x.shape
    KH, KW, _, Cout = w.shape
    pad_h = (KH - 1) // 2
    pad_w = (KW - 1) // 2
    S = stride
    Ho = (H + 2 * pad_h - KH) // S + 1
    Wo = (W + 2 * pad_w - KW) // S + 1
    M = Ho * Wo
    KC = KH * KW * Cin

    TH = _pick_th(Ho, Wo)
    TM = TH * Wo
    n_m = Ho // TH
    TC = _pick_tc(Cout)
    n_c = Cout // TC

    merge = (Wo % 8 == 0) or (TH == 1)          # (TH,Wo,*)->(TM,*) flatten is layout free
    per_tap = merge and (Cin >= PER_TAP_MIN_CIN)

    # TODO(synk): keep activations in the padded layout between layers (offset output
    # index_map / in-kernel halo masking) to remove this per-layer XLA pad pass.
    xp = jnp.pad(x.astype(jnp.bfloat16), ((0, 0), (pad_h, pad_h), (pad_w, pad_w), (0, 0)))
    xph = _phase_split(xp, S)                    # (N, S*S, Hp2, Wp2, Cin) bf16
    S2, Hp2, Wp2 = xph.shape[1], xph.shape[2], xph.shape[3]

    # Fold the BN scale into the conv weights (epilogue keeps only bias/residual/ReLU).
    wf = (w.reshape(KC, Cout) * scale.reshape(1, Cout)).astype(jnp.bfloat16)
    bi2 = bias.reshape(1, Cout).astype(jnp.float32)

    args = [xph, wf, bi2]
    in_specs = [
        pl.BlockSpec((1, S2, Hp2, Wp2, Cin), lambda n, j, m: (n, 0, 0, 0, 0)),
        pl.BlockSpec((KC, TC), lambda n, j, m: (0, j)),
        pl.BlockSpec((1, TC), lambda n, j, m: (0, j)),
    ]

    has_sc = sc is not None
    has_res = residual is not None
    if has_sc:
        assert KH == 3 and KW == 3 and pad_h == 1 and pad_w == 1, \
            "shortcut fusion reuses the center tap of a 3x3/pad-1 conv"
        sc_w, sc_scale, sc_bias = sc
        wsf = (sc_w.reshape(Cin, Cout) * sc_scale.reshape(1, Cout)).astype(jnp.bfloat16)
        bsf = sc_bias.reshape(1, Cout).astype(jnp.float32)
        args += [wsf, bsf]
        in_specs += [
            pl.BlockSpec((Cin, TC), lambda n, j, m: (0, j)),
            pl.BlockSpec((1, TC), lambda n, j, m: (0, j)),
        ]
    if has_res:
        args.append(residual.reshape(N, M, Cout).astype(jnp.bfloat16))
        in_specs.append(pl.BlockSpec((1, TM, TC), lambda n, j, m: (n, m, j)))

    out_spec = pl.BlockSpec((1, TM, TC), lambda n, j, m: (n, m, j))
    out_shape = jax.ShapeDtypeStruct((N, M, Cout), jnp.bfloat16)
    if has_sc:
        out_specs = (out_spec, pl.BlockSpec((1, TM, TC), lambda n, j, m: (n, m, j)))
        out_shapes = (out_shape, jax.ShapeDtypeStruct((N, M, Cout), jnp.bfloat16))
    else:
        out_specs = out_spec
        out_shapes = out_shape

    kernel = functools.partial(
        _conv_bn_kernel, KH=KH, KW=KW, S=S, TH=TH, Wo=Wo, Cin=Cin,
        relu=relu, has_sc=has_sc, has_res=has_res, merge=merge, per_tap=per_tap)

    # Grid order (N, Cout-tiles, M-tiles): weight/bias block index is constant over the
    # innermost axis (weights DMA'd once per (n, j)); the padded activation block is
    # constant over both inner axes.
    out = pl.pallas_call(
        kernel,
        grid=(N, n_c, n_m),
        in_specs=in_specs,
        out_specs=out_specs,
        out_shape=out_shapes,
        compiler_params=pltpu.CompilerParams(
            dimension_semantics=("parallel", "parallel", "parallel"),
            vmem_limit_bytes=_vmem_limit_bytes()),
    )(*args)

    if has_sc:
        o, s = out
        return o.reshape(N, Ho, Wo, Cout), s.reshape(N, Ho, Wo, Cout)
    return out.reshape(N, Ho, Wo, Cout)


def stats_pool(x):
    """x: (N, H, W, C) NHWC -> (N, 2*H*C) f32 = [all means, all stds], (h, c)-major order.

    Pools directly over the frames axis of the NHWC activation (no pre-pooling transpose).
    PyTorch's TSTP flattens (channel, feat) instead of (feat, channel); the difference is a
    fixed permutation of seg_1's weight rows, absorbed at (synthetic) init time.
    """
    N, H, W, C = x.shape
    assert W >= 2, "unbiased std (correction=1) needs at least 2 frames"
    TW = _largest_tile(W, 512, 8)
    n_t = W // TW
    out = pl.pallas_call(
        functools.partial(_stats_pool_kernel, T=W),
        grid=(N, n_t),
        in_specs=[pl.BlockSpec((1, H, TW, C), lambda n, t: (n, 0, t, 0))],
        out_specs=pl.BlockSpec((1, 2, H, C), lambda n, t: (n, 0, 0, 0)),
        out_shape=jax.ShapeDtypeStruct((N, 2, H, C), jnp.float32),
        scratch_shapes=[pltpu.VMEM((2, H, C), jnp.float32)],
        compiler_params=pltpu.CompilerParams(
            dimension_semantics=("parallel", "arbitrary"),
            vmem_limit_bytes=_vmem_limit_bytes()),
    )(x)
    return out.reshape(N, 2 * H * C)


def embedding_head(stats, w1, b1, w2, b2):
    """stats: (N, P) f32 -> (embed_a, embed_b), each (N, E) f32."""
    # TODO(synk): for production sizes (P ~ 5-10k) cast stats/w1 to bf16 with f32
    # accumulation, tile the first matmul over P and pad E to a multiple of 128.
    N, P = stats.shape
    E = w1.shape[1]
    bn_scale = 1.0 / math.sqrt(1.0 + BN_EPS)  # BatchNorm1d(affine=False), eval, default stats
    kernel = functools.partial(_head_kernel, bn_scale=bn_scale)
    return pl.pallas_call(
        kernel,
        grid=(1,),
        in_specs=[
            pl.BlockSpec((N, P), lambda i: (0, 0)),
            pl.BlockSpec((P, E), lambda i: (0, 0)),
            pl.BlockSpec((1, E), lambda i: (0, 0)),
            pl.BlockSpec((E, E), lambda i: (0, 0)),
            pl.BlockSpec((1, E), lambda i: (0, 0)),
        ],
        out_specs=(
            pl.BlockSpec((N, E), lambda i: (0, 0)),
            pl.BlockSpec((N, E), lambda i: (0, 0)),
        ),
        out_shape=(
            jax.ShapeDtypeStruct((N, E), jnp.float32),
            jax.ShapeDtypeStruct((N, E), jnp.float32),
        ),
        compiler_params=pltpu.CompilerParams(
            dimension_semantics=("arbitrary",),
            vmem_limit_bytes=_vmem_limit_bytes()),
    )(stats.astype(jnp.float32), w1, b1.reshape(1, E), w2, b2.reshape(1, E))


# ----------------------------------------------------------------------------
# Parameter initialization (deterministic, synthetic)
# ----------------------------------------------------------------------------
def _init_conv(key, kh, kw, cin, cout):
    return jax.random.normal(key, (kh, kw, cin, cout), jnp.float32) / math.sqrt(kh * kw * cin)


def _init_bn(key, c):
    k1, k2 = jax.random.split(key)
    gamma = 1.0 + 0.1 * jax.random.normal(k1, (c,), jnp.float32)
    beta = 0.1 * jax.random.normal(k2, (c,), jnp.float32)
    # fold eval-mode BN (running_mean=0, running_var=1) into scale/bias
    scale = gamma / jnp.sqrt(1.0 + BN_EPS)
    bias = beta
    return scale, bias


def _init_basic_block(key, cin, cout, stride):
    ks = jax.random.split(key, 6)
    p = {
        "stride": stride,
        "conv1_w": _init_conv(ks[0], 3, 3, cin, cout),
        "conv2_w": _init_conv(ks[1], 3, 3, cout, cout),
    }
    p["bn1_scale"], p["bn1_bias"] = _init_bn(ks[2], cout)
    p["bn2_scale"], p["bn2_bias"] = _init_bn(ks[3], cout)
    if stride != 1 or cin != cout:  # expansion = 1 (BasicBlock)
        p["sc_w"] = _init_conv(ks[4], 1, 1, cin, cout)
        p["sc_scale"], p["sc_bias"] = _init_bn(ks[5], cout)
    return p


def init_resnet_params(key, num_blocks, m_channels, feat_dim, embed_dim):
    keys = jax.random.split(key, 16)
    params = {"conv1_w": _init_conv(keys[0], 3, 3, 1, m_channels)}
    params["bn1_scale"], params["bn1_bias"] = _init_bn(keys[1], m_channels)

    in_planes = m_channels
    layer_defs = [
        (m_channels, num_blocks[0], 1),
        (m_channels * 2, num_blocks[1], 2),
        (m_channels * 4, num_blocks[2], 2),
        (m_channels * 8, num_blocks[3], 2),
    ]
    layers = []
    kidx = 2
    for planes, nblk, stride in layer_defs:
        strides = [stride] + [1] * (nblk - 1)
        blocks = []
        for s in strides:
            blocks.append(_init_basic_block(keys[kidx], in_planes, planes, s))
            kidx += 1
            in_planes = planes
        layers.append(blocks)
    params["layers"] = layers

    stats_dim = (feat_dim // 8) * m_channels * 8
    pool_out_dim = stats_dim * 2
    # NOTE: seg1_w rows follow this script's (feat, channel)-major stats flattening order
    # (a fixed permutation of the PyTorch ordering, free to apply at init time).
    params["seg1_w"] = jax.random.normal(keys[14], (pool_out_dim, embed_dim), jnp.float32) / math.sqrt(pool_out_dim)
    params["seg1_b"] = 0.01 * jax.random.normal(jax.random.fold_in(keys[14], 1), (embed_dim,), jnp.float32)
    params["seg2_w"] = jax.random.normal(keys[15], (embed_dim, embed_dim), jnp.float32) / math.sqrt(embed_dim)
    params["seg2_b"] = 0.01 * jax.random.normal(jax.random.fold_in(keys[15], 1), (embed_dim,), jnp.float32)
    return params


# ----------------------------------------------------------------------------
# Forward pass
# ----------------------------------------------------------------------------
def basic_block_forward(p, x):
    s = p["stride"]
    if "sc_w" in p:
        # Projection shortcut (1x1 stride-s conv + BN) emitted as a second output of the
        # conv1 kernel (reuses the VMEM-resident center tap; no extra HBM pass over x).
        out, res = conv_bn(x, p["conv1_w"], p["bn1_scale"], p["bn1_bias"], stride=s,
                           relu=True, sc=(p["sc_w"], p["sc_scale"], p["sc_bias"]))
    else:
        out = conv_bn(x, p["conv1_w"], p["bn1_scale"], p["bn1_bias"], stride=s, relu=True)
        res = x
    out = conv_bn(out, p["conv2_w"], p["bn2_scale"], p["bn2_bias"], stride=1, relu=True,
                  residual=res)
    return out


def resnet_forward(params, fbank):
    """fbank: (batch, frames, features) -> (embed_a, embed_b), each (batch, embed_dim)."""
    # torch: fbank.permute(0,2,1).unsqueeze(1) -> NCHW (B, 1, feat, frames)
    # here : NHWC (B, feat, frames, 1)
    x = jnp.transpose(fbank, (0, 2, 1))[..., None]

    x = conv_bn(x, params["conv1_w"], params["bn1_scale"], params["bn1_bias"],
                stride=1, relu=True)
    for blocks in params["layers"]:
        for blk in blocks:
            x = basic_block_forward(blk, x)

    # TSTP: pool over frames directly on the NHWC activation (no pre-pooling transpose).
    stats = stats_pool(x)
    # TODO(synk): optional `weights` argument of StatsPool (weighted statistics) is not implemented.

    embed_a, embed_b = embedding_head(
        stats, params["seg1_w"], params["seg1_b"], params["seg2_w"], params["seg2_b"])
    return embed_a, embed_b


# ----------------------------------------------------------------------------
# Main
# ----------------------------------------------------------------------------
if __name__ == "__main__":
    key = jax.random.PRNGKey(0)
    k_param, k_data = jax.random.split(key)

    # Small config: block=BasicBlock (expansion=1), num_blocks=[1,1,1,1],
    # m_channels=4, feat_dim=16, embed_dim=32, two_emb_layer=True.
    m_channels, feat_dim, embed_dim = 4, 16, 32
    num_blocks = [1, 1, 1, 1]
    batch, frames = 2, 16

    params = init_resnet_params(k_param, num_blocks, m_channels, feat_dim, embed_dim)
    fbank = jax.random.normal(k_data, (batch, frames, feat_dim), jnp.float32)

    embed_a, embed_b = resnet_forward(params, fbank)
    jax.block_until_ready((embed_a, embed_b))

    assert embed_a.shape == (batch, embed_dim)
    assert embed_b.shape == (batch, embed_dim)
    assert bool(jnp.all(jnp.isfinite(embed_a))) and bool(jnp.all(jnp.isfinite(embed_b)))
    print("KERNEL_OK")
</pallas_src>

<mosaic_0001>
module attributes {stable_mosaic.version = 11 : i64} {
  func.func @_conv_bn_kernel(%arg0: i32, %arg1: i32, %arg2: i32, %arg3: memref<1x1x18x18x1xbf16, #tpu.memory_space<vmem>>, %arg4: memref<9x4xbf16, #tpu.memory_space<vmem>>, %arg5: memref<1x4xf32, #tpu.memory_space<vmem>>, %arg6: memref<1x256x4xbf16, #tpu.memory_space<vmem>>) attributes {dimension_semantics = [#tpu.dimension_semantics<parallel>, #tpu.dimension_semantics<parallel>, #tpu.dimension_semantics<parallel>], iteration_bounds = array<i64: 2, 1, 1>, scalar_prefetch = 0 : i64, scratch_operands = 0 : i64, tpu.core_type = #tpu.core_type<tc>, window_params = [{transform_indices = @transform_0, window_bounds = array<i64: 1, 1, 18, 18, 1>}, {transform_indices = @transform_1, window_bounds = array<i64: 9, 4>}, {transform_indices = @transform_2, window_bounds = array<i64: 1, 4>}, {transform_indices = @transform_3, window_bounds = array<i64: 1, 256, 4>}]} {
    %c16_i32 = arith.constant 16 : i32
    %0 = arith.muli %arg2, %c16_i32 : i32
    %1 = tpu.assume_multiple %0, 16 : i32
    %c0_i32 = arith.constant 0 : i32
    %2 = arith.addi %1, %c0_i32 : i32
    %c0 = arith.constant 0 : index
    %c0_0 = arith.constant 0 : index
    %3 = arith.index_cast %2 : i32 to index
    %c0_1 = arith.constant 0 : index
    %c0_2 = arith.constant 0 : index
    %4 = vector.load %arg3[%c0, %c0_0, %3, %c0_1, %c0_2] : memref<1x1x18x18x1xbf16, #tpu.memory_space<vmem>>, vector<1x1x16x16x1xbf16>
    %5 = vector.shape_cast %4 : vector<1x1x16x16x1xbf16> to vector<16x16x1xbf16>
    %c0_i32_3 = arith.constant 0 : i32
    %6 = arith.addi %1, %c0_i32_3 : i32
    %c0_4 = arith.constant 0 : index
    %c0_5 = arith.constant 0 : index
    %7 = arith.index_cast %6 : i32 to index
    %c1 = arith.constant 1 : index
    %c0_6 = arith.constant 0 : index
    %8 = vector.load %arg3[%c0_4, %c0_5, %7, %c1, %c0_6] : memref<1x1x18x18x1xbf16, #tpu.memory_space<vmem>>, vector<1x1x16x16x1xbf16>
    %9 = vector.shape_cast %8 : vector<1x1x16x16x1xbf16> to vector<16x16x1xbf16>
    %c0_i32_7 = arith.constant 0 : i32
    %10 = arith.addi %1, %c0_i32_7 : i32
    %c0_8 = arith.constant 0 : index
    %c0_9 = arith.constant 0 : index
    %11 = arith.index_cast %10 : i32 to index
    %c2 = arith.constant 2 : index
    %c0_10 = arith.constant 0 : index
    %12 = vector.load %arg3[%c0_8, %c0_9, %11, %c2, %c0_10] : memref<1x1x18x18x1xbf16, #tpu.memory_space<vmem>>, vector<1x1x16x16x1xbf16>
    %13 = vector.shape_cast %12 : vector<1x1x16x16x1xbf16> to vector<16x16x1xbf16>
    %c1_i32 = arith.constant 1 : i32
    %14 = arith.addi %1, %c1_i32 : i32
    %c0_11 = arith.constant 0 : index
    %c0_12 = arith.constant 0 : index
    %15 = arith.index_cast %14 : i32 to index
    %c0_13 = arith.constant 0 : index
    %c0_14 = arith.constant 0 : index
    %16 = vector.load %arg3[%c0_11, %c0_12, %15, %c0_13, %c0_14] : memref<1x1x18x18x1xbf16, #tpu.memory_space<vmem>>, vector<1x1x16x16x1xbf16>
    %17 = vector.shape_cast %16 : vector<1x1x16x16x1xbf16> to vector<16x16x1xbf16>
    %c1_i32_15 = arith.constant 1 : i32
    %18 = arith.addi %1, %c1_i32_15 : i32
    %c0_16 = arith.constant 0 : index
    %c0_17 = arith.constant 0 : index
    %19 = arith.index_cast %18 : i32 to index
    %c1_18 = arith.constant 1 : index
    %c0_19 = arith.constant 0 : index
    %20 = vector.load %arg3[%c0_16, %c0_17, %19, %c1_18, %c0_19] : memref<1x1x18x18x1xbf16, #tpu.memory_space<vmem>>, vector<1x1x16x16x1xbf16>
    %21 = vector.shape_cast %20 : vector<1x1x16x16x1xbf16> to vector<16x16x1xbf16>
    %c1_i32_20 = arith.constant 1 : i32
    %22 = arith.addi %1, %c1_i32_20 : i32
    %c0_21 = arith.constant 0 : index
    %c0_22 = arith.constant 0 : index
    %23 = arith.index_cast %22 : i32 to index
    %c2_23 = arith.constant 2 : index
    %c0_24 = arith.constant 0 : index
    %24 = vector.load %arg3[%c0_21, %c0_22, %23, %c2_23, %c0_24] : memref<1x1x18x18x1xbf16, #tpu.memory_space<vmem>>, vector<1x1x16x16x1xbf16>
    %25 = vector.shape_cast %24 : vector<1x1x16x16x1xbf16> to vector<16x16x1xbf16>
    %c2_i32 = arith.constant 2 : i32
    %26 = arith.addi %1, %c2_i32 : i32
    %c0_25 = arith.constant 0 : index
    %c0_26 = arith.constant 0 : index
    %27 = arith.index_cast %26 : i32 to index
    %c0_27 = arith.constant 0 : index
    %c0_28 = arith.constant 0 : index
    %28 = vector.load %arg3[%c0_25, %c0_26, %27, %c0_27, %c0_28] : memref<1x1x18x18x1xbf16, #tpu.memory_space<vmem>>, vector<1x1x16x16x1xbf16>
    %29 = vector.shape_cast %28 : vector<1x1x16x16x1xbf16> to vector<16x16x1xbf16>
    %c2_i32_29 = arith.constant 2 : i32
    %30 = arith.addi %1, %c2_i32_29 : i32
    %c0_30 = arith.constant 0 : index
    %c0_31 = arith.constant 0 : index
    %31 = arith.index_cast %30 : i32 to index
    %c1_32 = arith.constant 1 : index
    %c0_33 = arith.constant 0 : index
    %32 = vector.load %arg3[%c0_30, %c0_31, %31, %c1_32, %c0_33] : memref<1x1x18x18x1xbf16, #tpu.memory_space<vmem>>, vector<1x1x16x16x1xbf16>
    %33 = vector.shape_cast %32 : vector<1x1x16x16x1xbf16> to vector<16x16x1xbf16>
    %c2_i32_34 = arith.constant 2 : i32
    %34 = arith.addi %1, %c2_i32_34 : i32
    %c0_35 = arith.constant 0 : index
    %c0_36 = arith.constant 0 : index
    %35 = arith.index_cast %34 : i32 to index
    %c2_37 = arith.constant 2 : index
    %c0_38 = arith.constant 0 : index
    %36 = vector.load %arg3[%c0_35, %c0_36, %35, %c2_37, %c0_38] : memref<1x1x18x18x1xbf16, #tpu.memory_space<vmem>>, vector<1x1x16x16x1xbf16>
    %37 = vector.shape_cast %36 : vector<1x1x16x16x1xbf16> to vector<16x16x1xbf16>
    %c0_39 = arith.constant 0 : index
    %c0_40 = arith.constant 0 : index
    %38 = vector.load %arg5[%c0_39, %c0_40] : memref<1x4xf32, #tpu.memory_space<vmem>>, vector<1x4xf32>
    %39 = tpu.concatenate %5, %9, %13, %17, %21, %25, %29, %33, %37 in 2 : vector<16x16x1xbf16>, vector<16x16x1xbf16>, vector<16x16x1xbf16>, vector<16x16x1xbf16>, vector<16x16x1xbf16>, vector<16x16x1xbf16>, vector<16x16x1xbf16>, vector<16x16x1xbf16>, vector<16x16x1xbf16> -> vector<16x16x9xbf16>
    %40 = vector.shape_cast %39 : vector<16x16x9xbf16> to vector<256x9xbf16>
    %c0_41 = arith.constant 0 : index
    %c0_42 = arith.constant 0 : index
    %41 = vector.load %arg4[%c0_41, %c0_42] : memref<9x4xbf16, #tpu.memory_space<vmem>>, vector<9x4xbf16>
    %cst = arith.constant dense<0.000000e+00> : vector<256x4xf32>
    %42 = tpu.matmul %40, %41, %cst {dimension_numbers = #tpu.dot_dimension_numbers<[1], [0], [0], [1], [0, 0, 1, 1], [], []>} : vector<256x9xbf16>, vector<9x4xbf16>, vector<256x4xf32> -> vector<256x4xf32>
    %43 = vector.broadcast %38 : vector<1x4xf32> to vector<256x4xf32>
    %44 = arith.addf %42, %43 : vector<256x4xf32>
    %cst_43 = arith.constant 0.000000e+00 : f32
    %45 = vector.broadcast %cst_43 : f32 to vector<256x4xf32>
    %46 = arith.maximumf %44, %45 : vector<256x4xf32>
    %47 = arith.truncf %46 : vector<256x4xf32> to vector<256x4xbf16>
    %c0_44 = arith.constant 0 : index
    %c0_45 = arith.constant 0 : index
    %c0_46 = arith.constant 0 : index
    %48 = vector.load %arg6[%c0_44, %c0_45, %c0_46] : memref<1x256x4xbf16, #tpu.memory_space<vmem>>, vector<1x256x4xbf16>
    %49 = vector.shape_cast %48 : vector<1x256x4xbf16> to vector<256x4xbf16>
    %50 = vector.shape_cast %47 : vector<256x4xbf16> to vector<1x256x4xbf16>
    tpu.vector_store %arg6[%c0_44, %c0_45, %c0_46], %50 {strides = array<i32>} : memref<1x256x4xbf16, #tpu.memory_space<vmem>>, vector<1x256x4xbf16>,
    return
  }
  func.func @transform_0(%arg0: i32, %arg1: i32, %arg2: i32) -> (i32, i32, i32, i32, i32) {
    %c0_i32 = arith.constant 0 : i32
    %c0_i32_0 = arith.constant 0 : i32
    %c0_i32_1 = arith.constant 0 : i32
    %c0_i32_2 = arith.constant 0 : i32
    %c0_i32_3 = arith.constant 0 : i32
    return %arg0, %c0_i32, %c0_i32_0, %c0_i32_1, %c0_i32_2 : i32, i32, i32, i32, i32
  }
  func.func @transform_1(%arg0: i32, %arg1: i32, %arg2: i32) -> (i32, i32) {
    %c0_i32 = arith.constant 0 : i32
    %c0_i32_0 = arith.constant 0 : i32
    return %c0_i32, %arg1 : i32, i32
  }
  func.func @transform_2(%arg0: i32, %arg1: i32, %arg2: i32) -> (i32, i32) {
    %c0_i32 = arith.constant 0 : i32
    %c0_i32_0 = arith.constant 0 : i32
    return %c0_i32, %arg1 : i32, i32
  }
  func.func @transform_3(%arg0: i32, %arg1: i32, %arg2: i32) -> (i32, i32, i32) {
    %c0_i32 = arith.constant 0 : i32
    return %arg0, %arg2, %arg1 : i32, i32, i32
  }
}

</mosaic_0001>

<bundles_post_ra>
// kernel: tpu_custom_call.1
= control target key start
LH: loop header
LB: loop body
LE: loop exit
PB: predicated region body
PF: predicated region fallthrough
CT: control target
= control target key end

     0   :  { %s3406_s12 = smov 0   ;;  %s3408_s13 = smov 0   ;;  %s4753_s0 = inlined_call_operand.vmem [shape: bf16[2,1,18,18,1], index: 0, kind: input, shape index: {}]   ;;  %s4754_s1 = inlined_call_operand.vmem [shape: bf16[9,4], index: 1, kind: input, shape index: {}]   ;;  %s4755_s2 = inlined_call_operand.vmem [shape: f32[1,4], index: 2, kind: input, shape index: {}]   ;;  %s4756_s3 = inlined_call_operand.vmem [shape: bf16[2,256,4], index: 3, kind: output, shape index: {}]  }
   0x1   :  { %s3410_s14 = smov 0  }
   0x2 LB: > { %s32_s15 = sadd.s32 1, %s3371_s13  ;;  %p2760_p0 = scmp.ge.s32.totalorder %s3375_s14, 1  ;;  %s3375_s14 = sphi %s3410_s14, %s13_s14   ;;  %s3371_s13 = sphi %s3408_s13, %s4776_s13   ;;  %s3367_s12 = sphi %s3406_s12, %s4775_s12  }
   0x3   : > { %p34_p1 = scmp.ge.s32.totalorder %s32_s15, 2  ;;  %p177_p2 = scmp.lt.s32.totalorder %s3375_s14, 3 }
   0x5   : > { %s4778_s15 = smov (%p34_p1, %s32_s15), 0  ;;  %p178_p3 = pnand %p2760_p0, %p177_p2 }
   0x7   : > { %181 = sbr.rel (%p178_p3) target bundleno = 616 (0x268), region = 32 }
   0xe   : > { %p215_p4 = scmp.lt.s32.totalorder %s3367_s12, 1  ;;  %s3377_s20 = smov 3   ;;  %vm847_vm0 = vcmask 1046528   ;;  %vm574_vm1 = vsmask.f32 7424  ;;  %vm2262_vm2 = vcmask 1043456  }
   0xf   : > { %s3378_s21 = smov 2   ;;  %s3379_s22 = smov 1   ;;  %vm2263_vm3 = vcmask 1044480   ;;  %vm1952_vm4 = vcmask 7168   ;;  %vm1985_vm5 = vcmask 15360   ;;  %vm2018_vm6 = vcmask 23552  }
  0x10   : > { %s4780_s12 = smov (!%p215_p4, %s3367_s12), 1  ;;  %s3380_s23 = smov 4   ;;  %vm2051_vm7 = vcmask 31744   ;;  %vm2084_vm8 = vcmask 39936   ;;  %vm2117_vm9 = vcmask 48128   ;;  %vm2150_vm10 = vcmask 56320  }
  0x11   : > { %s3174_s16 = smul.u32 216, %s4780_s12  ;;  %s3381_s24 = smov 5   ;;  %vm2183_vm11 = vcmask 64512   ;;  %vm2229_vm12 = vcmask 72704   ;;  %vm2590_vm13 = vcmask 27648  }
  0x12   : > { %s3382_s25 = smov 6   ;;  %s3383_s26 = smov 7  }
  0x13   : > { %s3430_s19 = scalar_lea.vmem %s4753_s0, %s3174_s16  ;;  %s3384_s27 = smov 8  }
  0x14   : > { %v2780_v0 = vld [vmem:[%s3430_s19 + $0x6c] sm:$0xf]  ;;  %v3434_v1 = vld [vmem:[%s3430_s19 + $0x70] sm:$0xf]  ;;  %v262_v6 = vld [vmem:[%s3430_s19 + $0x64] sm:$0xf] }
  0x15   : > { %v3437_v2 = vcombine.low %v2780_v0, %v3434_v1  ;;  %v2764_v3 = vld [vmem:[%s3430_s19 + $0xc] sm:$0xf]  ;;  %v3441_v4 = vld [vmem:[%s3430_s19 + $0x10] sm:$0xf]  ;;  %v301_v7 = vld [vmem:[%s3430_s19 + $0x60] sm:$0xe] }
  0x16   : > { %v3444_v5 = vcombine.low %v2764_v3, %v3441_v4  ;;  %v3451_v8 = vld [vmem:[%s3430_s19 + $0x68] ss:$0 sps:$4 sm:$0x11]   ;;  %v2932_v9 = vcombine.low %v301_v7, %v262_v6  ;;  %v261_v10 = vld [vmem:[%s3430_s19 + $0x60] sm:$0xf]  ;;  %s3088_s5 = sshll.u32 %s4780_s12, 7 }
  0x17   : > { %1024 = vrot.lane.b32.xlu1 %v3437_v2, %s3377_s20  ;;  %v1187_v11 = vshll.u32 %v3437_v2, 16  ;;  %v246_v12 = vld [vmem:[%s3430_s19 + $0x4] sm:$0xf]  ;;  %v873_v14 = vrot.slane %v3451_v8, 1  ;;  %v293_v15 = vld [vmem:[%s3430_s19] sm:$0xe]  ;;  %v3462_v18 = vcombine.low %v261_v10, %v262_v6  ;;  %s4651_s8 = scalar_lea.vmem %s4756_s3, %s3088_s5 }
  0x18   : > { %1008 = vrot.lane.b32.xlu0 %v3444_v5, %s3377_s20  ;;  %v872_v13 = vrot.slane %v2932_v9, 1  ;;  %v245_v16 = vld [vmem:[%s3430_s19] sm:$0xf]  ;;  %v1091_v17 = vshll.u32 %v3444_v5, 16  ;;  %v2924_v20 = vcombine.low %v293_v15, %v246_v12  ;;  %v263_v21 = vld [vmem:[%s3430_s19 + $0x6c] sm:$0xf] }
  0x19   : > { %v3215_v19 = vld [vmem:[%s3430_s19 + $0x8] ss:$0 sps:$4 sm:$0x11]   ;;  %v3467_v23 = vcombine.low %v245_v16, %v246_v12  ;;  %v264_v24 = vld [vmem:[%s3430_s19 + $0x70] sm:$0xf]  ;;  %v672_v30 = vshrl.u32 %v3462_v18, 16 }
  0x1a   : > { %v874_v22 = vsel %vm847_vm0, %v872_v13, %v873_v14  ;;  %v302_v25 = vld [vmem:[%s3430_s19 + $0x6c] sm:$0xe]  ;;  %v848_v26 = vrot.slane %v2924_v20, 1  ;;  %v849_v27 = vrot.slane %v3215_v19, 1  ;;  %v3474_v31 = vcombine.low %v263_v21, %v264_v24  ;;  %v248_v33 = vld [vmem:[%s3430_s19 + $0x10] sm:$0xf] }
  0x1b   : > { %912 = vrot.lane.b32.xlu1 %v874_v22, %s3378_s21  ;;  %v3219_v28 = vld [vmem:[%s3430_s19 + $0x74] ss:$0 sps:$4 sm:$0x11]   ;;  %v2933_v29 = vcombine.low %v302_v25, %v264_v24  ;;  %v247_v32 = vld [vmem:[%s3430_s19 + $0xc] sm:$0xf]  ;;  %v576_v41 = vshrl.u32 %v3467_v23, 16 }
  0x1c   : > { %v850_v34 = vsel %vm847_vm0, %v848_v26, %v849_v27  ;;  %v876_v36 = vrot.slane %v3219_v28, 1  ;;  %v294_v37 = vld [vmem:[%s3430_s19 + $0xc] sm:$0xe]  ;;  %v3480_v38 = vcombine.low %v247_v32, %v248_v33  ;;  %v3222_v39 = vld [vmem:[%s3430_s19 + $0x14] ss:$0 sps:$4 sm:$0x11]  }
  0x1d   : > { %v875_v35 = vrot.slane %v2933_v29, 1  ;;  %896 = vrot.lane.b32.xlu0 %v850_v34, %s3378_s21  ;;  %v2925_v40 = vcombine.low %v294_v37, %v248_v33  ;;  %v578_v42 = vshll.u32 %v3467_v23, 16  ;;  %v583_v43 = vshll.u32 %v3215_v19, 16  ;;  %v2782_v52 = vld [vmem:[%s3430_s19 + $0x78] sm:$0xf] }
  0x1e   : > { %v588_v45 = vshrl.u32 %v3480_v38, 16  ;;  %v590_v46 = vshll.u32 %v3480_v38, 16  ;;  %v684_v47 = vshrl.u32 %v3474_v31, 16  ;;  %v852_v49 = vrot.slane %v3222_v39, 1  ;;  %v3494_v57 = vld [vmem:[%s3430_s19 + $0x7c] sm:$0xf] }
  0x1f   : > { %v877_v44 = vsel %vm847_vm0, %v875_v35, %v876_v36  ;;  %v851_v48 = vrot.slane %v2925_v40, 1  ;;  %v595_v50 = vshll.u32 %v3222_v39, 16  ;;  %v580_v51 = vrot.slane %v578_v42, 1  ;;  %v2766_v62 = vld [vmem:[%s3430_s19 + $0x18] sm:$0xf] }
  0x20   : > { %914 = vrot.lane.b32.xlu1 %v877_v44, %s3378_s21  ;;  %v592_v53 = vrot.slane %v590_v46, 1  ;;  %v585_v54 = vrot.slane %v583_v43, 1  ;;  %v686_v55 = vshll.u32 %v3474_v31, 16  ;;  %v691_v56 = vshll.u32 %v3219_v28, 16  ;;  %v3500_v63 = vld [vmem:[%s3430_s19 + $0x1c] sm:$0xf] }
  0x21   : > { %v853_v58 = vsel %vm847_vm0, %v851_v48, %v852_v49  ;;  %v597_v59 = vrot.slane %v595_v50, 1  ;;  %v581_v60 = vor.u32 %v580_v51, %v576_v41  ;;  %v674_v61 = vshll.u32 %v3462_v18, 16  ;;  %v3507_v13 = vld [vmem:[%s3430_s19 + $0x74] ss:$0 sps:$4 sm:$0x11]  }
  0x22   : > { %898 = vrot.lane.b32.xlu0 %v853_v58, %s3378_s21  ;;  %v593_v0 = vor.u32 %v592_v53, %v588_v45  ;;  %v688_v3 = vrot.slane %v686_v55, 1  ;;  %v693_v6 = vrot.slane %v691_v56, 1  ;;  %v679_v7 = vshll.u32 %v3451_v8, 16  ;;  %v3512_v20 = vld [vmem:[%s3430_s19 + $0x14] ss:$0 sps:$4 sm:$0x11]  }
  0x23   : > { %v586_v9 = vsel %vm574_vm1, %v581_v60, %v585_v54  ;;  %v676_v10 = vrot.slane %v674_v61, 1  ;;  %v2949_v12 = vcombine.low %v2782_v52, %v3494_v57  ;;  %v2941_v19 = vcombine.low %v2766_v62, %v3500_v63  ;;  %v3519_v24 = vld [vmem:[%s3430_s19 + $0x80] ss:$0 sps:$4 sm:$0x11]   ;;  %v2820_v35 = vld [vmem:[%s3430_s19 + $0x6c] sm:$0xe] }
  0x24   : > { %v598_v14 = vsel %vm574_vm1, %v593_v0, %v597_v59  ;;  %v689_v15 = vor.u32 %v688_v3, %v684_v47  ;;  %v681_v16 = vrot.slane %v679_v7, 1  ;;  %v1185_v21 = vshrl.u32 %v3437_v2, 16  ;;  %v2812_v43 = vld [vmem:[%s3430_s19 + $0xc] sm:$0xe]  ;;  %v2821_v45 = vld [vmem:[%s3430_s19 + $0x78] sm:$0xe] }
  0x25   : > { %769 = vrot.lane.b32.xlu1 %v598_v14, %s3379_s22  ;;  %v677_v8 = vor.u32 %v676_v10, %v672_v30  ;;  %v1189_v22 = vrot.slane %v1187_v11, 1  ;;  %v1199_v26 = vshll.u32 %v2949_v12, 16  ;;  %v1192_v27 = vshll.u32 %v3507_v13, 16  ;;  %v3530_v11 = vld [vmem:[%s3430_s19 + $0x20] ss:$0 sps:$4 sm:$0x11]  }
  0x26   : > { %767 = vrot.lane.b32.xlu0 %v586_v9, %s3379_s22  ;;  %v694_v25 = vsel %vm574_vm1, %v689_v15, %v693_v6  ;;  %v1089_v28 = vshrl.u32 %v3444_v5, 16  ;;  %v1103_v30 = vshll.u32 %v2941_v19, 16  ;;  %v1093_v32 = vrot.slane %v1091_v17, 1  ;;  %v2813_v50 = vld [vmem:[%s3430_s19 + $0x18] sm:$0xe] }
  0x27   : > { %v682_v29 = vsel %vm574_vm1, %v677_v8, %v681_v16  ;;  %v1096_v2 = vshll.u32 %v3512_v20, 16  ;;  %v1190_v33 = vor.u32 %v1189_v22, %v1185_v21  ;;  %v1194_v34 = vrot.slane %v1192_v27, 1  ;;  %v2844_v55 = vld [vmem:[%s3430_s19 + $0x78] sm:$0xf]  ;;  %v3550_v56 = vld [vmem:[%s3430_s19 + $0x7c] sm:$0xf] }
  0x28   : > { %v1094_v36 = vor.u32 %v1093_v32, %v1089_v28  ;;  %v1197_v37 = vshrl.u32 %v2949_v12, 16  ;;  %v1201_v39 = vrot.slane %v1199_v26, 1  ;;  %v1204_v5 = vshll.u32 %v3519_v24, 16  ;;  %v2828_v3 = vld [vmem:[%s3430_s19 + $0x18] sm:$0xf] }
  0x29   : > { %785 = vrot.lane.b32.xlu1 %v694_v25, %s3379_s22  ;;  %v1098_v17 = vrot.slane %v1096_v2, 1  ;;  %v1101_v40 = vshrl.u32 %v2941_v19, 16  ;;  %v1105_v41 = vrot.slane %v1103_v30, 1  ;;  %v1108_v42 = vshll.u32 %v3530_v11, 16  ;;  %v3561_v6 = vld [vmem:[%s3430_s19 + $0x1c] sm:$0xf] }
  0x2a   : > { %783 = vrot.lane.b32.xlu0 %v682_v29, %s3379_s22  ;;  %v2980_v44 = vcombine.low %v2820_v35, %v3434_v1  ;;  %v1195_v46 = vsel %vm574_vm1, %v1190_v33, %v1194_v34  ;;  %v1202_v47 = vor.u32 %v1201_v39, %v1197_v37  ;;  %v1206_v48 = vrot.slane %v1204_v5, 1  ;;  %v2830_v16 = vld [vmem:[%s3430_s19 + $0x24] sm:$0xf]  ;;  %v3581_v21 = vld [vmem:[%s3430_s19 + $0x80] ss:$0 sps:$4 sm:$0x11]  }
  0x2b   : > { %v2972_v49 = vcombine.low %v2812_v43, %v3441_v4  ;;  %v1099_v51 = vsel %vm574_vm1, %v1094_v36, %v1098_v17  ;;  %v1106_v52 = vor.u32 %v1105_v41, %v1101_v40  ;;  %v1110_v53 = vrot.slane %v1108_v42, 1  ;;  %v3588_v27 = vld [vmem:[%s3430_s19 + $0x20] ss:$0 sps:$4 sm:$0x11]   ;;  %v265_v37 = vld [vmem:[%s3430_s19 + $0x78] sm:$0xf] }
  0x2c   : > { %v1384_v1 = vrot.slane %v2980_v44, 1  ;;  %v1385_v54 = vrot.slane %v3507_v13, 1  ;;  %v2981_v58 = vcombine.low %v2821_v45, %v3494_v57  ;;  %v2973_v4 = vcombine.low %v2813_v50, %v3500_v63  ;;  %v2846_v63 = vld [vmem:[%s3430_s19 + $0x84] sm:$0xf]  ;;  %v3570_v13 = vld [vmem:[%s3430_s19 + $0x88] sm:$0xf] }
  0x2d   : > { %1026 = vrot.lane.b32.xlu1 %v2949_v12, %s3377_s20  ;;  %v1207_v59 = vsel %vm574_vm1, %v1202_v47, %v1206_v48  ;;  %v1111_v60 = vsel %vm574_vm1, %v1106_v52, %v1110_v53  ;;  %v1360_v61 = vrot.slane %v2972_v49, 1  ;;  %v1361_v62 = vrot.slane %v3512_v20, 1  ;;  %v3597_v34 = vld [vmem:[%s3430_s19 + $0x2c] ss:$0 sps:$4 sm:$0x11]  }
  0x2e   : > { %1010 = vrot.lane.b32.xlu0 %v2941_v19, %s3377_s20  ;;  %v2996_v0 = vcombine.low %v2844_v55, %v3550_v56  ;;  %v1386_v57 = vsel %vm847_vm0, %v1384_v1, %v1385_v54  ;;  %v1387_v7 = vrot.slane %v2981_v58, 1  ;;  %v1388_v9 = vrot.slane %v3519_v24, 1  ;;  %v3576_v19 = vld [vmem:[%s3430_s19 + $0x28] sm:$0xf]  ;;  %v3602_v39 = vld [vmem:[%s3430_s19 + $0x7c] sm:$0xf] }
  0x2f   : > { %v1363_v10 = vrot.slane %v2973_v4, 1  ;;  %v1364_v12 = vrot.slane %v3530_v11, 1  ;;  %v1362_v14 = vsel %vm847_vm0, %v1360_v61, %v1361_v62  ;;  %v2988_v15 = vcombine.low %v2828_v3, %v3561_v6  ;;  %v3593_v11 = vld [vmem:[%s3430_s19 + $0x8c] ss:$0 sps:$4 sm:$0x11]  }
  0x30   : > { %v1699_v20 = vshll.u32 %v2996_v0, 16  ;;  %v2997_v8 = vcombine.low %v2846_v63, %v3570_v13  ;;  %v1389_v22 = vsel %vm847_vm0, %v1387_v7, %v1388_v9  ;;  %v2989_v24 = vcombine.low %v2830_v16, %v3576_v19  ;;  %v249_v17 = vld [vmem:[%s3430_s19 + $0x18] sm:$0xf]  ;;  %v3606_v40 = vld [vmem:[%s3430_s19 + $0x1c] sm:$0xf] }
  0x31   : > { %1296 = vrot.lane.b32.xlu1 %v1195_v46, %s3380_s23  ;;  %v1365_v25 = vsel %vm847_vm0, %v1363_v10, %v1364_v12  ;;  %v1603_v26 = vshll.u32 %v2988_v15, 16  ;;  %v1697_v28 = vshrl.u32 %v2996_v0, 16  ;;  %v1704_v32 = vshll.u32 %v3581_v21, 16  ;;  %v2884_v41 = vld [vmem:[%s3430_s19 + $0x78] sm:$0xe] }
  0x32   : > { %1280 = vrot.lane.b32.xlu0 %v1099_v51, %s3380_s23  ;;  %v1701_v29 = vrot.slane %v1699_v20, 1  ;;  %v1711_v30 = vshll.u32 %v2997_v8, 16  ;;  %v1601_v2 = vshrl.u32 %v2988_v15, 16  ;;  %v1615_v33 = vshll.u32 %v2989_v24, 16  ;;  %v2876_v46 = vld [vmem:[%s3430_s19 + $0x18] sm:$0xe] }
  0x33   : > { %v1605_v35 = vrot.slane %v1603_v26, 1  ;;  %v1608_v36 = vshll.u32 %v3588_v27, 16  ;;  %v1706_v42 = vrot.slane %v1704_v32, 1  ;;  %v1709_v43 = vshrl.u32 %v2997_v8, 16  ;;  %v251_v9 = vld [vmem:[%s3430_s19 + $0x24] sm:$0xf] }
  0x34   : > { %v1702_v5 = vor.u32 %v1701_v29, %v1697_v28  ;;  %v1713_v44 = vrot.slane %v1711_v30, 1  ;;  %v1716_v45 = vshll.u32 %v3593_v11, 16  ;;  %v1613_v47 = vshrl.u32 %v2989_v24, 16  ;;  %v3624_v4 = vld [vmem:[%s3430_s19 + $0x80] ss:$0 sps:$4 sm:$0x11]  }
  0x35   : > { %1298 = vrot.lane.b32.xlu1 %v1207_v59, %s3380_s23  ;;  %v1617_v48 = vrot.slane %v1615_v33, 1  ;;  %v1620_v49 = vshll.u32 %v3597_v34, 16  ;;  %v3615_v50 = vcombine.low %v265_v37, %v3602_v39  ;;  %v1606_v51 = vor.u32 %v1605_v35, %v1601_v2  ;;  %v3641_v10 = vld [vmem:[%s3430_s19 + $0x28] sm:$0xf]  ;;  %v2885_v12 = vld [vmem:[%s3430_s19 + $0x84] sm:$0xe] }
  0x36   : > { %1282 = vrot.lane.b32.xlu0 %v1111_v60, %s3380_s23  ;;  %v1610_v52 = vrot.slane %v1608_v36, 1  ;;  %v3618_v53 = vcombine.low %v249_v17, %v3606_v40  ;;  %v3028_v1 = vcombine.low %v2884_v41, %v3550_v56  ;;  %v3020_v54 = vcombine.low %v2876_v46, %v3561_v6  ;;  %v3630_v56 = vld [vmem:[%s3430_s19 + $0x20] ss:$0 sps:$4 sm:$0x11]   ;;  %v267_v6 = vld [vmem:[%s3430_s19 + $0x84] sm:$0xf] }
  0x37   : > { %v1714_v55 = vor.u32 %v1713_v44, %v1709_v43  ;;  %v1718_v58 = vrot.slane %v1716_v45, 1  ;;  %v1707_v59 = vsel %vm574_vm1, %v1702_v5, %v1706_v42  ;;  %v1618_v60 = vor.u32 %v1617_v48, %v1613_v47  ;;  %v3666_v36 = vld [vmem:[%s3430_s19 + $0x8c] ss:$0 sps:$4 sm:$0x11]  }
  0x38   : > { %v1622_v61 = vrot.slane %v1620_v49, 1  ;;  %v698_v62 = vshll.u32 %v3615_v50, 16  ;;  %v602_v3 = vshll.u32 %v3618_v53, 16  ;;  %v1896_v63 = vrot.slane %v3028_v1, 1 }
  0x39   : > { %1424 = vrot.lane.b32.xlu1 %v1386_v57, %s3381_s24  ;;  %v3636_v57 = vld [vmem:[%s3430_s19 + $0x88] sm:$0xf]  ;;  %v1897_v7 = vrot.slane %v3581_v21, 1  ;;  %v1873_v16 = vrot.slane %v3588_v27, 1  ;;  %v703_v20 = vshll.u32 %v3624_v4, 16  ;;  %v600_v26 = vshrl.u32 %v3618_v53, 16 }
  0x3a   : > { %1408 = vrot.lane.b32.xlu0 %v1362_v14, %s3381_s24  ;;  %v1719_v14 = vsel %vm574_vm1, %v1714_v55, %v1718_v58  ;;  %v1623_v21 = vsel %vm574_vm1, %v1618_v60, %v1622_v61  ;;  %v604_v28 = vrot.slane %v602_v3, 1  ;;  %v607_v27 = vshll.u32 %v3630_v56, 16 }
  0x3b   : > { %v3658_v29 = vcombine.low %v251_v9, %v3641_v10  ;;  %v3029_v30 = vcombine.low %v2885_v12, %v3570_v13  ;;  %v705_v2 = vrot.slane %v703_v20, 1  ;;  %v1898_v33 = vsel %vm847_vm0, %v1896_v63, %v1897_v7  ;;  %v3671_v13 = vld [vmem:[%s3430_s19 + $0x2c] ss:$0 sps:$4 sm:$0x11]   ;;  %v296_v63 = vld [vmem:[%s3430_s19 + $0x24] sm:$0xe] }
  0x3c   : > { %v605_v17 = vor.u32 %v604_v28, %v600_v26  ;;  %v609_v41 = vrot.slane %v607_v27, 1  ;;  %v1900_v43 = vrot.slane %v3593_v11, 1  ;;  %v1876_v45 = vrot.slane %v3597_v34, 1  ;;  %v295_v34 = vld [vmem:[%s3430_s19 + $0x18] sm:$0xe] }
  0x3d   : > { %1426 = vrot.lane.b32.xlu1 %v1389_v22, %s3381_s24  ;;  %v696_v22 = vshrl.u32 %v3615_v50, 16  ;;  %4764 = vst [vmem:[#allocation3_spill] sm:$0xff] %v3658_v29  ;;  %v1899_v42 = vrot.slane %v3029_v30, 1  ;;  %v715_v49 = vshll.u32 %v3666_v36, 16  ;;  %v612_v1 = vshrl.u32 %v3658_v29, 16 }
  0x3e   : > { %1410 = vrot.lane.b32.xlu0 %v1365_v25, %s3381_s24  ;;  %v3653_v25 = vcombine.low %v267_v6, %v3636_v57  ;;  %v2926_v61 = vcombine.low %v295_v34, %v3606_v40  ;;  %v879_v7 = vrot.slane %v3624_v4, 1  ;;  %v855_v9 = vrot.slane %v3630_v56, 1  ;;  %v2768_v56 = vld [vmem:[%s3430_s19 + $0x24] sm:$0xf]  ;;  %v2786_v28 = vld [vmem:[%s3430_s19 + $0x90] sm:$0xf] }
  0x3f   : > { %v1901_v55 = vsel %vm847_vm0, %v1899_v42, %v1900_v43  ;;  %v2927_v4 = vcombine.low %v296_v63, %v3641_v10  ;;  %v3718_v10 = vld [vmem:[%s3430_s19 + $0x94] sm:$0xf]  ;;  %v2814_v34 = vld [vmem:[%s3430_s19 + $0x24] sm:$0xe] }
  0x40   : > { %4763 = vst [vmem:[#allocation2_spill] sm:$0xff] %v3653_v25  ;;  %v710_v37 = vshll.u32 %v3653_v25, 16  ;;  %v708_v47 = vshrl.u32 %v3653_v25, 16  ;;  %v4132_v25 = vld [vmem:[%s3430_s19 + $0x4c] sm:$0xf] }
  0x41   : > { %1536 = vrot.lane.b32.xlu1 %v2996_v0, %s3382_s25  ;;  %v1611_v0 = vsel %vm574_vm1, %v1606_v51, %v1610_v52  ;;  %v303_v51 = vld [vmem:[%s3430_s19 + $0x78] sm:$0xe]  ;;  %v610_v52 = vsel %vm574_vm1, %v605_v17, %v609_v41  ;;  %v857_v30 = vrot.slane %v2927_v4, 1  ;;  %v3732_v41 = vld [vmem:[%s3430_s19 + $0x8c] ss:$0 sps:$4 sm:$0x11]  }
  0x42   : > { %1520 = vrot.lane.b32.xlu0 %v2988_v15, %s3382_s25  ;;  %v1872_v15 = vrot.slane %v3020_v54, 1  ;;  %v712_v48 = vrot.slane %v710_v37, 1  ;;  %v619_v54 = vshll.u32 %v3671_v13, 16  ;;  %v2934_v60 = vcombine.low %v303_v51, %v3602_v39 }
  0x43   : > { %v1391_v4 = vrot.slane %v3732_v41, 1 }
  0x44   : > { %v1874_v5 = vsel %vm847_vm0, %v1872_v15, %v1873_v16  ;;  %v713_v58 = vor.u32 %v712_v48, %v708_v47  ;;  %v621_v6 = vrot.slane %v619_v54, 1  ;;  %v878_v40 = vrot.slane %v2934_v60, 1  ;;  %v2784_v15 = vld [vmem:[%s3430_s19 + $0x84] sm:$0xf]  ;;  %v3702_v16 = vld [vmem:[%s3430_s19 + $0x88] sm:$0xf] }
  0x45   : > { %1538 = vrot.lane.b32.xlu1 %v2997_v8, %s3382_s25  ;;  %v2877_v8 = vld [vmem:[%s3430_s19 + $0x24] sm:$0xe]  ;;  %v1216_v47 = vshll.u32 %v3732_v41, 16 }
  0x46   : > { %1522 = vrot.lane.b32.xlu0 %v2989_v24, %s3382_s25  ;;  %v700_v24 = vrot.slane %v698_v62, 1  ;;  %v3021_v32 = vcombine.low %v2877_v8, %v3576_v19  ;;  %v614_v19 = vshll.u32 %v3658_v29, 16  ;;  %v304_v62 = vld [vmem:[%s3430_s19 + $0x84] sm:$0xe]  ;;  %v3708_v8 = vld [vmem:[%s3430_s19 + $0x28] sm:$0xf] }
  0x47   : > { %v2935_v12 = vcombine.low %v304_v62, %v3636_v57  ;;  %v2942_v26 = vcombine.low %v2768_v56, %v3708_v8  ;;  %v2974_v63 = vcombine.low %v2814_v34, %v3708_v8  ;;  %v2848_v56 = vld [vmem:[%s3430_s19 + $0x90] sm:$0xf]  ;;  %v3765_v8 = vld [vmem:[%s3430_s19 + $0x94] sm:$0xf]  ;;  %v257_v29 = vld [vmem:[%s3430_s19 + $0x48] sm:$0xf] }
  0x48   : > { %v701_v35 = vor.u32 %v700_v24, %v696_v22  ;;  %v1875_v44 = vrot.slane %v3021_v32, 1  ;;  %v616_v11 = vrot.slane %v614_v19, 1  ;;  %v2950_v22 = vcombine.low %v2784_v15, %v3702_v16  ;;  %v3736_v19 = vld [vmem:[%s3430_s19 + $0x2c] ss:$0 sps:$4 sm:$0x11]  }
  0x49   : > { %1808 = vrot.lane.b32.xlu1 %v1707_v59, %s3383_s26  ;;  %v717_v59 = vrot.slane %v715_v49, 1  ;;  %v881_v57 = vrot.slane %v2935_v12, 1  ;;  %v880_v24 = vsel %vm847_vm0, %v878_v40, %v879_v7  ;;  %v858_v32 = vrot.slane %v3671_v13, 1  ;;  %v3742_v49 = vld [vmem:[%s3430_s19 + $0x98] ss:$0 sps:$4 sm:$0x11]  }
  0x4a   : > { %1792 = vrot.lane.b32.xlu0 %v1611_v0, %s3383_s26  ;;  %v706_v46 = vsel %vm574_vm1, %v701_v35, %v705_v2  ;;  %v1877_v0 = vsel %vm847_vm0, %v1875_v44, %v1876_v45  ;;  %v617_v3 = vor.u32 %v616_v11, %v612_v1  ;;  %v2770_v2 = vld [vmem:[%s3430_s19 + $0x30] sm:$0xf]  ;;  %v1211_v35 = vshll.u32 %v2950_v22, 16  ;;  %v2822_v1 = vld [vmem:[%s3430_s19 + $0x84] sm:$0xe] }
  0x4b   : > { %v718_v39 = vsel %vm574_vm1, %v713_v58, %v717_v59  ;;  %v859_v13 = vsel %vm847_vm0, %v857_v30, %v858_v32  ;;  %v1209_v43 = vshrl.u32 %v2950_v22, 16  ;;  %v1113_v45 = vshrl.u32 %v2942_v26, 16  ;;  %v2823_v7 = vld [vmem:[%s3430_s19 + $0x90] sm:$0xe]  ;;  %v3778_v30 = vld [vmem:[%s3430_s19 + $0xa0] sm:$0xf] }
  0x4c   : > { %v622_v20 = vsel %vm574_vm1, %v617_v3, %v621_v6  ;;  %v1213_v44 = vrot.slane %v1211_v35, 1  ;;  %v1120_v51 = vshll.u32 %v3736_v19, 16  ;;  %v1228_v60 = vshll.u32 %v3742_v49, 16  ;;  %v2815_v40 = vld [vmem:[%s3430_s19 + $0x30] sm:$0xe] }
  0x4d   : > { %1810 = vrot.lane.b32.xlu1 %v1719_v14, %s3383_s26  ;;  %v854_v14 = vrot.slane %v2926_v61, 1  ;;  %v2982_v6 = vcombine.low %v2822_v1, %v3702_v16  ;;  %v3784_v35 = vld [vmem:[%s3430_s19 + $0x40] sm:$0xf]  ;;  %v3806_v1 = vld [vmem:[%s3430_s19 + $0xa4] ss:$0 sps:$4 sm:$0x11]  }
  0x4e   : > { %1794 = vrot.lane.b32.xlu0 %v1623_v21, %s3383_s26  ;;  %v882_v21 = vrot.slane %v3666_v36, 1  ;;  %v2951_v36 = vcombine.low %v2786_v28, %v3718_v10  ;;  %v1214_v11 = vor.u32 %v1213_v44, %v1209_v43  ;;  %v1122_v61 = vrot.slane %v1120_v51, 1  ;;  %v3774_v28 = vld [vmem:[%s3430_s19 + $0x34] sm:$0xf] }
  0x4f   : > { %v856_v27 = vsel %vm847_vm0, %v854_v14, %v855_v9 }
  0x50   : > { %v883_v37 = vsel %vm847_vm0, %v881_v57, %v882_v21  ;;  %v1223_v42 = vshll.u32 %v2951_v36, 16  ;;  %v1221_v54 = vshrl.u32 %v2951_v36, 16  ;;  %v2983_v57 = vcombine.low %v2823_v7, %v3718_v10  ;;  %v2834_v10 = vld [vmem:[%s3430_s19 + $0x3c] sm:$0xf]  ;;  %v269_v7 = vld [vmem:[%s3430_s19 + $0x90] sm:$0xf] }
  0x51   : > { %1936 = vrot.lane.b32.xlu1 %v1898_v33, %s3384_s27  ;;  %v3724_v33 = vld [vmem:[%s3430_s19 + $0x34] sm:$0xf]  ;;  %v1366_v21 = vrot.slane %v2974_v63, 1 }
  0x52   : > { %1920 = vrot.lane.b32.xlu0 %v1874_v5, %s3384_s27  ;;  %v1115_v5 = vshll.u32 %v2942_v26, 16  ;;  %v2943_v17 = vcombine.low %v2770_v2, %v3724_v33  ;;  %v1225_v59 = vrot.slane %v1223_v42, 1  ;;  %v2975_v32 = vcombine.low %v2815_v40, %v3724_v33  ;;  %v253_v40 = vld [vmem:[%s3430_s19 + $0x30] sm:$0xf] }
  0x53   : > { %v1394_v33 = vrot.slane %v3742_v49, 1 }
  0x54   : > { %v1117_v48 = vrot.slane %v1115_v5, 1  ;;  %v1125_v62 = vshrl.u32 %v2943_v17, 16  ;;  %v1226_v12 = vor.u32 %v1225_v59, %v1221_v54  ;;  %v1369_v42 = vrot.slane %v2975_v32, 1 }
  0x55   : > { %787 = vrot.lane.b32.xlu1 %v706_v46, %s3379_s22  ;;  %v1127_v46 = vshll.u32 %v2943_v17, 16 }
  0x56   : > { %771 = vrot.lane.b32.xlu0 %v610_v52, %s3379_s22  ;;  %v3746_v52 = vld [vmem:[%s3430_s19 + $0x38] ss:$0 sps:$4 sm:$0x11]   ;;  %v1118_v58 = vor.u32 %v1117_v48, %v1113_v45 }
  0x57   : > { %v1132_v3 = vshll.u32 %v3746_v52, 16  ;;  %v1370_v43 = vrot.slane %v3746_v52, 1  ;;  %v3797_v45 = vld [vmem:[%s3430_s19 + $0x98] ss:$0 sps:$4 sm:$0x11]  }
  0x58   : > { %v1123_v14 = vsel %vm574_vm1, %v1118_v58, %v1122_v61  ;;  %v2886_v52 = vld [vmem:[%s3430_s19 + $0x90] sm:$0xe] }
  0x59   : > { %1938 = vrot.lane.b32.xlu1 %v1901_v55, %s3384_s27  ;;  %v1218_v55 = vrot.slane %v1216_v47, 1  ;;  %v1134_v16 = vrot.slane %v1132_v3, 1  ;;  %v3801_v47 = vld [vmem:[%s3430_s19 + $0x38] ss:$0 sps:$4 sm:$0x11]   ;;  %v1740_v3 = vshll.u32 %v3806_v1, 16 }
  0x5a   : > { %1922 = vrot.lane.b32.xlu0 %v1877_v0, %s3384_s27  ;;  %v1129_v0 = vrot.slane %v1127_v46, 1 }
  0x5b   : > { %v1219_v9 = vsel %vm574_vm1, %v1214_v11, %v1218_v55  ;;  %v1371_v11 = vsel %vm847_vm0, %v1369_v42, %v1370_v43  ;;  %v1728_v55 = vshll.u32 %v3797_v45, 16  ;;  %v1903_v43 = vrot.slane %v3797_v45, 1 }
  0x5c   : > { %v1130_v15 = vor.u32 %v1129_v0, %v1125_v62  ;;  %v3814_v62 = vld [vmem:[%s3430_s19 + $0x44] ss:$0 sps:$4 sm:$0x11]  }
  0x5d   : > { %789 = vrot.lane.b32.xlu1 %v718_v39, %s3379_s22  ;;  %v1230_v39 = vrot.slane %v1228_v60, 1  ;;  %v1632_v60 = vshll.u32 %v3801_v47, 16 }
  0x5e   : > { %773 = vrot.lane.b32.xlu0 %v622_v20, %s3379_s22  ;;  %v1390_v20 = vrot.slane %v2982_v6, 1  ;;  %v1135_v2 = vsel %vm574_vm1, %v1130_v15, %v1134_v16  ;;  %v3312_v15 = vld [vmem:[%s4754_s1] sm:$0x1f]   ;;  %v1644_v16 = vshll.u32 %v3814_v62, 16 }
  0x61   : > { %916 = vrot.lane.b32.xlu1 %v880_v24, %s3378_s21  ;;  %v2832_v24 = vld [vmem:[%s3430_s19 + $0x30] sm:$0xf] }
  0x62   : > { %900 = vrot.lane.b32.xlu0 %v856_v27, %s3378_s21  ;;  %v2850_v27 = vld [vmem:[%s3430_s19 + $0x9c] sm:$0xf]  ;;  %v2990_v5 = vcombine.low %v2832_v24, %v3774_v28 }
  0x63   : > { %v2999_v41 = vcombine.low %v2850_v27, %v3778_v30 }
  0x64   : > { %v1627_v46 = vshll.u32 %v2990_v5, 16  ;;  %v1625_v58 = vshrl.u32 %v2990_v5, 16 }
  0x65   : > { %918 = vrot.lane.b32.xlu1 %v883_v37, %s3378_s21  ;;  %v1393_v37 = vrot.slane %v2983_v57, 1  ;;  %v1735_v49 = vshll.u32 %v2999_v41, 16  ;;  %v1733_v61 = vshrl.u32 %v2999_v41, 16 }
  0x66   : > { %902 = vrot.lane.b32.xlu0 %v859_v13, %s3378_s21  ;;  %v2991_v13 = vcombine.low %v2834_v10, %v3784_v35  ;;  %v1629_v59 = vrot.slane %v1627_v46, 1  ;;  %v1742_v10 = vrot.slane %v1740_v3, 1  ;;  %v271_v46 = vld [vmem:[%s3430_s19 + $0x9c] sm:$0xf] }
  0x67   : > { %v1395_v48 = vsel %vm847_vm0, %v1393_v37, %v1394_v33  ;;  %v1737_v0 = vrot.slane %v1735_v49, 1  ;;  %v1646_v37 = vrot.slane %v1644_v16, 1  ;;  %v3862_v49 = vld [vmem:[%s3430_s19 + $0x40] sm:$0xf] }
  0x68   : > { %v1639_v51 = vshll.u32 %v2991_v13, 16  ;;  %v1637_v6 = vshrl.u32 %v2991_v13, 16  ;;  %v3891_v16 = vld [vmem:[%s3430_s19 + $0xa4] ss:$0 sps:$4 sm:$0x11]  }
  0x69   : > { %1028 = vrot.lane.b32.xlu1 %v2950_v22, %s3377_s20  ;;  %v1367_v22 = vrot.slane %v3736_v19, 1 }
  0x6a   : > { %1012 = vrot.lane.b32.xlu0 %v2942_v26, %s3377_s20  ;;  %v1231_v26 = vsel %vm574_vm1, %v1226_v12, %v1230_v39  ;;  %v1641_v63 = vrot.slane %v1639_v51, 1  ;;  %v3821_v12 = vld [vmem:[%s3430_s19 + $0x94] sm:$0xf]  ;;  %v3030_v39 = vcombine.low %v2886_v52, %v3765_v8  ;;  %v2887_v51 = vld [vmem:[%s3430_s19 + $0x9c] sm:$0xe] }
  0x6b   : > { %v1368_v19 = vsel %vm847_vm0, %v1366_v21, %v1367_v22  ;;  %v1630_v21 = vor.u32 %v1629_v59, %v1625_v58  ;;  %v1634_v22 = vrot.slane %v1632_v60, 1 }
  0x6c   : > { %v1902_v33 = vrot.slane %v3030_v39, 1 }
  0x6d   : > { %1030 = vrot.lane.b32.xlu1 %v2951_v36, %s3377_s20  ;;  %v2998_v36 = vcombine.low %v2848_v56, %v3765_v8  ;;  %v3835_v56 = vcombine.low %v269_v7, %v3821_v12  ;;  %v3385_v8 = vmov 65535   ;;  %v3031_v7 = vcombine.low %v2887_v51, %v3778_v30 }
  0x6e   : > { %1014 = vrot.lane.b32.xlu0 %v2943_v17, %s3377_s20  ;;  %v1392_v17 = vsel %vm847_vm0, %v1390_v20, %v1391_v4  ;;  %v1730_v4 = vrot.slane %v1728_v55, 1  ;;  %v2264_v57 = vsel %vm2262_vm2, 4294967295, %v3385_v8  ;;  %v1879_v55 = vrot.slane %v3801_v47, 1 }
  0x6f   : > { %v1723_v44 = vshll.u32 %v2998_v36, 16  ;;  %v1721_v54 = vshrl.u32 %v2998_v36, 16  ;;  %4765 = vst [vmem:[#allocation4_spill] sm:$0xff] %v3835_v56  ;;  %v720_v58 = vshrl.u32 %v3835_v56, 16  ;;  %v1904_v39 = vsel %vm847_vm0, %v1902_v33, %v1903_v43  ;;  %v305_v43 = vld [vmem:[%s3430_s19 + $0x90] sm:$0xe] }
  0x71   : > { %1300 = vrot.lane.b32.xlu1 %v1219_v9, %s3380_s23  ;;  %v1725_v34 = vrot.slane %v1723_v44, 1  ;;  %v2878_v9 = vld [vmem:[%s3430_s19 + $0x30] sm:$0xe] }
  0x72   : > { %1284 = vrot.lane.b32.xlu0 %v1123_v14, %s3380_s23  ;;  %v3826_v14 = vld [vmem:[%s3430_s19 + $0x34] sm:$0xf]  ;;  %v3022_v27 = vcombine.low %v2878_v9, %v3774_v28  ;;  %v722_v28 = vshll.u32 %v3835_v56, 16 }
  0x73   : > { %v1726_v20 = vor.u32 %v1725_v34, %v1721_v54  ;;  %v3838_v24 = vcombine.low %v253_v40, %v3826_v14 }
  0x74   : > { %v1878_v34 = vrot.slane %v3022_v27, 1  ;;  %v724_v59 = vrot.slane %v722_v28, 1  ;;  %v1906_v27 = vrot.slane %v3806_v1, 1 }
  0x75   : > { %1302 = vrot.lane.b32.xlu1 %v1231_v26, %s3380_s23  ;;  %4766 = vst [vmem:[#allocation5_spill] sm:$0xff] %v3838_v24  ;;  %v2265_v26 = vsel %vm2263_vm3, %v2264_v57, 0  ;;  %v626_v44 = vshll.u32 %v3838_v24, 16 }
  0x76   : > { %1286 = vrot.lane.b32.xlu0 %v1135_v2, %s3380_s23  ;;  %v2267_v32 = vand.u32 %v3312_v15, %v2265_v26  ;;  %v1738_v2 = vor.u32 %v1737_v0, %v1733_v61  ;;  %v624_v0 = vshrl.u32 %v3838_v24, 16  ;;  %v725_v40 = vor.u32 %v724_v59, %v720_v58  ;;  %v306_v59 = vld [vmem:[%s3430_s19 + $0x9c] sm:$0xe] }
  0x77   : > { %v628_v3 = vrot.slane %v626_v44, 1  ;;  %v1880_v8 = vsel %vm847_vm0, %v1878_v34, %v1879_v55  ;;  %v1905_v26 = vrot.slane %v3031_v7, 1  ;;  %v297_v44 = vld [vmem:[%s3430_s19 + $0x30] sm:$0xe] }
  0x78   : > { %3138 = vmatprep.subr.bf16.mxu0 %v2267_v32  ;;  %3172 = vmatprep.subr.bf16.mxu1 %v2267_v32  ;;  %v1743_v54 = vsel %vm574_vm1, %v1738_v2, %v1742_v10  ;;  %v1882_v2 = vrot.slane %v3814_v62, 1  ;;  %v2928_v58 = vcombine.low %v297_v44, %v3826_v14 }
  0x79   : > { %1428 = vrot.lane.b32.xlu1 %v1392_v17, %s3381_s24  ;;  %v1731_v17 = vsel %vm574_vm1, %v1726_v20, %v1730_v4  ;;  %3139 = vmatpush3.bf16.msra.mxu0 %v2267_v32  ;;  %v629_v57 = vor.u32 %v628_v3, %v624_v0  ;;  %v298_v0 = vld [vmem:[%s3430_s19 + $0x3c] sm:$0xe] }
  0x7a   : > { %1412 = vrot.lane.b32.xlu0 %v1368_v19, %s3381_s24  ;;  %v1635_v19 = vsel %vm574_vm1, %v1630_v21, %v1634_v22  ;;  %3173 = vmatpush3.bf16.msra.mxu1 %v2267_v32  ;;  %v3898_v21 = vld [vmem:[%s3430_s19 + $0x44] ss:$0 sps:$4 sm:$0x11]   ;;  %v2788_v3 = vld [vmem:[%s3430_s19 + $0x9c] sm:$0xf] }
  0x7b   : > { %v643_v1 = vshll.u32 %v3898_v21, 16 }
  0x7d   : > { %1430 = vrot.lane.b32.xlu1 %v1395_v48, %s3381_s24  ;;  %v255_v48 = vld [vmem:[%s3430_s19 + $0x3c] sm:$0xf]  ;;  %v645_v55 = vrot.slane %v643_v1, 1 }
  0x7e   : > { %1414 = vrot.lane.b32.xlu0 %v1371_v11, %s3381_s24  ;;  %v2879_v11 = vld [vmem:[%s3430_s19 + $0x3c] sm:$0xe] }
  0x7f   : > { %v3023_v9 = vcombine.low %v2879_v11, %v3784_v35  ;;  %v2936_v11 = vcombine.low %v305_v43, %v3821_v12  ;;  %v3973_v43 = vld [vmem:[%s3430_s19 + $0xa4] ss:$0 sps:$4 sm:$0x11]  }
  0x81   : > { %1540 = vrot.lane.b32.xlu1 %v2998_v36, %s3382_s25  ;;  %v1642_v36 = vor.u32 %v1641_v63, %v1637_v6  ;;  %v3881_v63 = vcombine.low %v255_v48, %v3862_v49  ;;  %v1881_v32 = vrot.slane %v3023_v9, 1  ;;  %v884_v7 = vrot.slane %v2936_v11, 1 }
  0x82   : > { %1524 = vrot.lane.b32.xlu0 %v2990_v5, %s3382_s25  ;;  %v3843_v5 = vld [vmem:[%s3430_s19 + $0x98] ss:$0 sps:$4 sm:$0x11]  }
  0x83   : > { %v1647_v45 = vsel %vm574_vm1, %v1642_v36, %v1646_v37  ;;  %v727_v60 = vshll.u32 %v3843_v5, 16  ;;  %4768 = vst [vmem:[#allocation7_spill] sm:$0xff] %v3881_v63  ;;  %v638_v35 = vshll.u32 %v3881_v63, 16  ;;  %v636_v28 = vshrl.u32 %v3881_v63, 16 }
  0x84   : > { %v885_v14 = vrot.slane %v3843_v5, 1 }
  0x85   : > { %1542 = vrot.lane.b32.xlu1 %v2999_v41, %s3382_s25  ;;  %v3849_v41 = vld [vmem:[%s3430_s19 + $0x38] ss:$0 sps:$4 sm:$0x11]   ;;  %v729_v15 = vrot.slane %v727_v60, 1 }
  0x86   : > { %1526 = vrot.lane.b32.xlu0 %v2991_v13, %s3382_s25  ;;  %v3858_v13 = vld [vmem:[%s3430_s19 + $0xa0] sm:$0xf]  ;;  %v631_v6 = vshll.u32 %v3849_v41, 16 }
  0x87   : > { %v3876_v61 = vcombine.low %v271_v46, %v3858_v13  ;;  %v730_v10 = vsel %vm574_vm1, %v725_v40, %v729_v15  ;;  %v1907_v46 = vsel %vm847_vm0, %v1905_v26, %v1906_v27  ;;  %v2937_v9 = vcombine.low %v306_v59, %v3858_v13  ;;  %v2790_v13 = vld [vmem:[%s3430_s19 + $0xa8] sm:$0xf]  ;;  %v3953_v26 = vld [vmem:[%s3430_s19 + $0xac] sm:$0xf] }
  0x88   : > { %v633_v30 = vrot.slane %v631_v6, 1  ;;  %v3932_v6 = vld [vmem:[%s3430_s19 + $0xa0] sm:$0xf]  ;;  %v860_v15 = vrot.slane %v2928_v58, 1  ;;  %v886_v27 = vsel %vm847_vm0, %v884_v7, %v885_v14  ;;  %v2953_v1 = vcombine.low %v2790_v13, %v3953_v26 }
  0x89   : > { %v3852_v42 = vpop.permute.xlu1 %1024  ;;  %1812 = vrot.lane.b32.xlu1 %v1731_v17, %s3383_s26  ;;  %4767 = vst [vmem:[#allocation6_spill] sm:$0xff] %v3876_v61  ;;  %v734_v20 = vshll.u32 %v3876_v61, 16  ;;  %v732_v36 = vshrl.u32 %v3876_v61, 16  ;;  %v739_v17 = vshll.u32 %v3891_v16, 16  ;;  %v2952_v5 = vcombine.low %v2788_v3, %v3932_v6 }
  0x8a   : > { %v3867_v52 = vpop.permute.xlu0 %1008  ;;  %1796 = vrot.lane.b32.xlu0 %v1635_v19, %s3383_s26  ;;  %v634_v33 = vsel %vm574_vm1, %v629_v57, %v633_v30  ;;  %v640_v19 = vrot.slane %v638_v35, 1  ;;  %v2772_v57 = vld [vmem:[%s3430_s19 + $0x3c] sm:$0xf]  ;;  %v3945_v30 = vld [vmem:[%s3430_s19 + $0x40] sm:$0xf] }
  0x8b   : > { %v736_v37 = vrot.slane %v734_v20, 1  ;;  %v741_v51 = vrot.slane %v739_v17, 1  ;;  %v861_v20 = vrot.slane %v3849_v41, 1  ;;  %v887_v41 = vrot.slane %v2937_v9, 1 }
  0x8c   : > { %v641_v34 = vor.u32 %v640_v19, %v636_v28  ;;  %v1235_v19 = vshll.u32 %v2952_v5, 16  ;;  %v3995_v9 = vld [vmem:[%s3430_s19 + $0x50] ss:$0 sps:$4 sm:$0x11]  }
  0x8d   : > { %v3883_v47 = vpop.permute.xlu1 %912  ;;  %1814 = vrot.lane.b32.xlu1 %v1743_v54, %s3383_s26  ;;  %v737_v48 = vor.u32 %v736_v37, %v732_v36  ;;  %v862_v37 = vsel %vm847_vm0, %v860_v15, %v861_v20  ;;  %v2824_v15 = vld [vmem:[%s3430_s19 + $0x9c] sm:$0xe] }
  0x8e   : > { %1798 = vrot.lane.b32.xlu0 %v1647_v45, %s3383_s26  ;;  %v1883_v45 = vsel %vm847_vm0, %v1881_v32, %v1882_v2  ;;  %v646_v40 = vsel %vm574_vm1, %v641_v34, %v645_v55  ;;  %v2944_v32 = vcombine.low %v2772_v57, %v3945_v30  ;;  %v2774_v2 = vld [vmem:[%s3430_s19 + $0x48] sm:$0xf]  ;;  %v1233_v34 = vshrl.u32 %v2952_v5, 16  ;;  %v2816_v57 = vld [vmem:[%s3430_s19 + $0x3c] sm:$0xe] }
  0x8f   : > { %v3894_v4 = vpop.permute.xlu0 %896  ;;  %v742_v12 = vsel %vm574_vm1, %v737_v48, %v741_v51  ;;  %v3981_v51 = vld [vmem:[%s3430_s19 + $0x44] ss:$0 sps:$4 sm:$0x11]   ;;  %v1237_v55 = vrot.slane %v1235_v19, 1  ;;  %v2984_v19 = vcombine.low %v2824_v15, %v3932_v6  ;;  %v2817_v6 = vld [vmem:[%s3430_s19 + $0x48] sm:$0xe] }
  0x90   : > { %v1137_v58 = vshrl.u32 %v2944_v32, 16  ;;  %v1144_v14 = vshll.u32 %v3981_v51, 16  ;;  %v1397_v15 = vrot.slane %v3973_v43, 1 }
  0x91   : > { %1940 = vrot.lane.b32.xlu1 %v1904_v39, %s3384_s27  ;;  %v1238_v20 = vor.u32 %v1237_v55, %v1233_v34 }
  0x92   : > { %v3902_v22 = vpop.permute.xlu1 %914  ;;  %1924 = vrot.lane.b32.xlu0 %v1880_v8, %s3384_s27  ;;  %v2929_v8 = vcombine.low %v298_v0, %v3862_v49  ;;  %v888_v49 = vrot.slane %v3891_v16, 1  ;;  %v1240_v0 = vshll.u32 %v3973_v43, 16 }
  0x94   : > { %v3914_v62 = vpop.permute.xlu0 %898  ;;  %v863_v17 = vrot.slane %v2929_v8, 1  ;;  %v889_v44 = vsel %vm847_vm0, %v887_v41, %v888_v49  ;;  %v1245_v8 = vshrl.u32 %v2953_v1, 16  ;;  %v1242_v13 = vrot.slane %v1240_v0, 1 }
  0x95   : > { %791 = vrot.lane.b32.xlu1 %v730_v10, %s3379_s22  ;;  %v3961_v10 = vld [vmem:[%s3430_s19 + $0x4c] sm:$0xf] }
  0x96   : > { %775 = vrot.lane.b32.xlu0 %v634_v33, %s3379_s22  ;;  %v864_v33 = vrot.slane %v3898_v21, 1  ;;  %v2945_v16 = vcombine.low %v2774_v2, %v3961_v10  ;;  %v1243_v34 = vsel %vm574_vm1, %v1238_v20, %v1242_v13  ;;  %v2836_v20 = vld [vmem:[%s3430_s19 + $0x48] sm:$0xf] }
  0x97   : > { %v3921_v54 = vpop.permute.xlu1 %769 }
  0x98   : > { %v3926_v60 = vpop.permute.xlu0 %767  ;;  %v865_v21 = vsel %vm847_vm0, %v863_v17, %v864_v33  ;;  %v1151_v59 = vshll.u32 %v2945_v16, 16  ;;  %v1149_v17 = vshrl.u32 %v2945_v16, 16 }
  0x99   : > { %1942 = vrot.lane.b32.xlu1 %v1907_v46, %s3384_s27  ;;  %v1139_v46 = vshll.u32 %v2944_v32, 16 }
  0x9a   : > { %1926 = vrot.lane.b32.xlu0 %v1883_v45, %s3384_s27  ;;  %v1247_v45 = vshll.u32 %v2953_v1, 16  ;;  %v1153_v33 = vrot.slane %v1151_v59, 1 }
  0x9b   : > { %v3938_v39 = vpop.permute.xlu1 %785  ;;  %v1141_v3 = vrot.slane %v1139_v46, 1  ;;  %v2852_v46 = vld [vmem:[%s3430_s19 + $0xa8] sm:$0xf] }
  0x9c   : > { %v3947_v35 = vpop.permute.xlu0 %783  ;;  %v1249_v41 = vrot.slane %v1247_v45, 1  ;;  %v2825_v45 = vld [vmem:[%s3430_s19 + $0xa8] sm:$0xe] }
  0x9d   : > { %793 = vrot.lane.b32.xlu1 %v742_v12, %s3379_s22  ;;  %v3989_v12 = vld [vmem:[%s3430_s19 + $0xb0] ss:$0 sps:$4 sm:$0x11]  }
  0x9e   : > { %777 = vrot.lane.b32.xlu0 %v646_v40, %s3379_s22  ;;  %v1252_v49 = vshll.u32 %v3989_v12, 16  ;;  %v1250_v55 = vor.u32 %v1249_v41, %v1245_v8  ;;  %v4031_v8 = vld [vmem:[%s3430_s19 + $0x4c] sm:$0xf]  ;;  %v2854_v41 = vld [vmem:[%s3430_s19 + $0xb4] sm:$0xf] }
  0x9f   : > { %v3963_v36 = vpop.permute.xlu1 %1026 }
  0xa0   : > { %v3967_v28 = vpop.permute.xlu0 %1010 }
  0xa1   : > { %920 = vrot.lane.b32.xlu1 %v886_v27, %s3378_s21  ;;  %v1142_v27 = vor.u32 %v1141_v3, %v1137_v58  ;;  %v1254_v58 = vrot.slane %v1252_v49, 1  ;;  %v1154_v3 = vor.u32 %v1153_v33, %v1149_v17  ;;  %v4038_v49 = vld [vmem:[%s3430_s19 + $0xb8] sm:$0xf]  ;;  %v2838_v17 = vld [vmem:[%s3430_s19 + $0x54] sm:$0xf] }
  0xa2   : > { %904 = vrot.lane.b32.xlu0 %v862_v37, %s3378_s21  ;;  %v1146_v37 = vrot.slane %v1144_v14, 1 }
  0xa3   : > { %v3977_v48 = vpop.permute.xlu1 %1296  ;;  %v1255_v43 = vsel %vm574_vm1, %v1250_v55, %v1254_v58  ;;  %v1400_v58 = vrot.slane %v3989_v12, 1 }
  0xa4   : > { %v3983_v11 = vpop.permute.xlu0 %1280  ;;  %v1147_v0 = vsel %vm574_vm1, %v1142_v27, %v1146_v37  ;;  %v1373_v27 = vrot.slane %v3981_v51, 1  ;;  %v2977_v37 = vcombine.low %v2817_v6, %v3961_v10  ;;  %v4052_v51 = vld [vmem:[%s3430_s19 + $0x58] sm:$0xf] }
  0xa5   : > { %922 = vrot.lane.b32.xlu1 %v889_v44, %s3378_s21 }
  0xa6   : > { %906 = vrot.lane.b32.xlu0 %v865_v21, %s3378_s21  ;;  %v2976_v21 = vcombine.low %v2816_v57, %v3945_v30  ;;  %v2985_v57 = vcombine.low %v2825_v45, %v3953_v26  ;;  %v1375_v6 = vrot.slane %v2977_v37, 1  ;;  %v1954_v37 = vsel %vm1952_vm4, %v3467_v23, %v3926_v60 }
  0xa7   : > { %v3991_v7 = vpop.permute.xlu1 %1298 }
  0xa8   : > { %v3997_v40 = vpop.permute.xlu0 %1282  ;;  %v1372_v13 = vrot.slane %v2976_v21, 1  ;;  %v4060_v21 = vcombine.low %v2854_v41, %v4038_v49  ;;  %v1399_v55 = vrot.slane %v2985_v57, 1  ;;  %v4087_v41 = vld [vmem:[%s3430_s19 + $0xbc] ss:$0 sps:$4 sm:$0x11]  }
  0xa9   : > { %1032 = vrot.lane.b32.xlu1 %v2952_v5, %s3377_s20  ;;  %v1156_v5 = vshll.u32 %v3995_v9, 16 }
  0xaa   : > { %1016 = vrot.lane.b32.xlu0 %v2944_v32, %s3377_s20  ;;  %v4012_v32 = vld [vmem:[%s3430_s19 + $0xac] sm:$0xf] }
  0xab   : > { %v4004_v2 = vpop.permute.xlu1 %1424  ;;  %v1158_v30 = vrot.slane %v1156_v5, 1 }
  0xac   : > { %v4008_v44 = vpop.permute.xlu0 %1408 }
  0xad   : > { %1034 = vrot.lane.b32.xlu1 %v2953_v1, %s3377_s20  ;;  %v4024_v1 = vcombine.low %v2852_v46, %v4012_v32  ;;  %v1159_v5 = vsel %vm574_vm1, %v1154_v3, %v1158_v30  ;;  %v4055_v46 = vld [vmem:[%s3430_s19 + $0xb0] ss:$0 sps:$4 sm:$0x11]   ;;  %v4069_v3 = vcombine.low %v2838_v17, %v4052_v51 }
  0xae   : > { %1018 = vrot.lane.b32.xlu0 %v2945_v16, %s3377_s20  ;;  %v1396_v16 = vrot.slane %v2984_v19, 1  ;;  %v4049_v19 = vcombine.low %v2836_v20, %v4031_v8  ;;  %v1752_v57 = vshll.u32 %v4055_v46, 16 }
  0xaf   : > { %v4020_v59 = vpop.permute.xlu1 %1426  ;;  %v1747_v26 = vshll.u32 %v4024_v1, 16 }
  0xb0   : > { %v4026_v14 = vpop.permute.xlu0 %1410  ;;  %v1398_v45 = vsel %vm847_vm0, %v1396_v16, %v1397_v15  ;;  %v1651_v20 = vshll.u32 %v4049_v19, 16  ;;  %v1745_v16 = vshrl.u32 %v4024_v1, 16  ;;  %v1754_v61 = vrot.slane %v1752_v57, 1 }
  0xb1   : > { %1304 = vrot.lane.b32.xlu1 %v1243_v34, %s3380_s23  ;;  %v1374_v34 = vsel %vm847_vm0, %v1372_v13, %v1373_v27  ;;  %v1749_v15 = vrot.slane %v1747_v26, 1  ;;  %v4080_v13 = vld [vmem:[%s3430_s19 + $0x50] ss:$0 sps:$4 sm:$0x11]   ;;  %v1970_v27 = vsel %vm1952_vm4, %v3462_v18, %v3947_v35  ;;  %v1663_v18 = vshll.u32 %v4069_v3, 16 }
  0xb2   : > { %1288 = vrot.lane.b32.xlu0 %v1147_v0, %s3380_s23  ;;  %v1376_v0 = vrot.slane %v3995_v9, 1  ;;  %v1759_v9 = vshll.u32 %v4060_v21, 16  ;;  %v4098_v35 = vld [vmem:[%s3430_s19 + $0x5c] ss:$0 sps:$4 sm:$0x11]   ;;  %v1649_v24 = vshrl.u32 %v4049_v19, 16  ;;  %v2003_v23 = vsel %vm1985_vm5, %v1970_v27, %v3883_v47 }
  0xb3   : > { %v4044_v33 = vpop.permute.xlu1 %1536  ;;  %v1750_v63 = vor.u32 %v1749_v15, %v1745_v16  ;;  %v1653_v56 = vrot.slane %v1651_v20, 1  ;;  %v1661_v20 = vshrl.u32 %v4069_v3, 16  ;;  %v1665_v15 = vrot.slane %v1663_v18, 1 }
  0xb4   : > { %v4057_v10 = vpop.permute.xlu0 %1520  ;;  %v1377_v17 = vsel %vm847_vm0, %v1375_v6, %v1376_v0  ;;  %v1987_v6 = vsel %vm1985_vm5, %v1954_v37, %v3894_v4  ;;  %v1764_v0 = vshll.u32 %v4087_v41, 16  ;;  %v1668_v57 = vshll.u32 %v4098_v35, 16  ;;  %v4117_v4 = vld [vmem:[%s3430_s19 + $0xac] sm:$0xf] }
  0xb5   : > { %1306 = vrot.lane.b32.xlu1 %v1255_v43, %s3380_s23  ;;  %v1401_v43 = vsel %vm847_vm0, %v1399_v55, %v1400_v58  ;;  %v1757_v55 = vshrl.u32 %v4060_v21, 16  ;;  %v1761_v58 = vrot.slane %v1759_v9, 1  ;;  %v273_v9 = vld [vmem:[%s3430_s19 + $0xa8] sm:$0xf]  ;;  %v2036_v27 = vsel %vm2018_vm6, %v2003_v23, %v3852_v42 }
  0xb6   : > { %1290 = vrot.lane.b32.xlu0 %v1159_v5, %s3380_s23  ;;  %v2888_v5 = vld [vmem:[%s3430_s19 + $0xa8] sm:$0xe] }
  0xb7   : > { %v4071_v30 = vpop.permute.xlu1 %1538  ;;  %v3032_v47 = vcombine.low %v2888_v5, %v4012_v32  ;;  %v2069_v32 = vsel %vm2051_vm7, %v2036_v27, %v3977_v48  ;;  %v1666_v48 = vor.u32 %v1665_v15, %v1661_v20  ;;  %v4193_v15 = vld [vmem:[%s3430_s19 + $0xb8] sm:$0xf]  ;;  %v259_v27 = vld [vmem:[%s3430_s19 + $0x54] sm:$0xf] }
  0xb8   : > { %v4076_v12 = vpop.permute.xlu0 %1522 }
  0xb9   : > { %1432 = vrot.lane.b32.xlu1 %v1398_v45, %s3381_s24  ;;  %v2880_v45 = vld [vmem:[%s3430_s19 + $0x48] sm:$0xe] }
  0xba   : > { %1416 = vrot.lane.b32.xlu0 %v1374_v34, %s3381_s24  ;;  %v1656_v34 = vshll.u32 %v4080_v13, 16  ;;  %v3024_v16 = vcombine.low %v2880_v45, %v4031_v8  ;;  %v2020_v8 = vsel %vm2018_vm6, %v1987_v6, %v3867_v52  ;;  %v1762_v45 = vor.u32 %v1761_v58, %v1757_v55 }
  0xbb   : > { %v1809_v26 = vpop.permute.xlu1 %1808  ;;  %v2053_v42 = vsel %vm2051_vm7, %v2020_v8, %v3983_v11  ;;  %v1670_v11 = vrot.slane %v1668_v57, 1  ;;  %v1885_v6 = vrot.slane %v4080_v13, 1 }
  0xbc   : > { %v1793_v60 = vpop.permute.xlu0 %1792  ;;  %v1658_v18 = vrot.slane %v1656_v34, 1  ;;  %v2086_v52 = vsel %vm2084_vm8, %v2053_v42, %v4008_v44  ;;  %v4156_v44 = vcombine.low %v257_v29, %v4132_v25  ;;  %v1909_v29 = vrot.slane %v4055_v46, 1  ;;  %v2889_v42 = vld [vmem:[%s3430_s19 + $0xb4] sm:$0xe] }
  0xbd   : > { %1434 = vrot.lane.b32.xlu1 %v1401_v43, %s3381_s24  ;;  %v1755_v43 = vsel %vm574_vm1, %v1750_v63, %v1754_v61  ;;  %v2102_v61 = vsel %vm2084_vm8, %v2069_v32, %v4004_v2  ;;  %v1972_v2 = vsel %vm1952_vm4, %v3474_v31, %v3938_v39  ;;  %v1908_v31 = vrot.slane %v3032_v47, 1  ;;  %v4164_v39 = vld [vmem:[%s3430_s19 + $0xb0] ss:$0 sps:$4 sm:$0x11]  }
  0xbe   : > { %1418 = vrot.lane.b32.xlu0 %v1377_v17, %s3381_s24  ;;  %v1654_v17 = vor.u32 %v1653_v56, %v1649_v24  ;;  %v1766_v56 = vrot.slane %v1764_v0, 1  ;;  %v4141_v24 = vcombine.low %v273_v9, %v4117_v4  ;;  %v2135_v63 = vsel %vm2117_vm9, %v2102_v61, %v4044_v33  ;;  %v2881_v61 = vld [vmem:[%s3430_s19 + $0x54] sm:$0xe] }
  0xbf   : > { %v4121_v37 = vpop.permute.xlu1 %1810  ;;  %v2168_v23 = vsel %vm2150_vm10, %v2135_v63, %v1809_v26  ;;  %v1956_v33 = vsel %vm1952_vm4, %v3480_v38, %v3921_v54  ;;  %v1884_v38 = vrot.slane %v3024_v16, 1  ;;  %v4173_v26 = vld [vmem:[%s3430_s19 + $0x50] ss:$0 sps:$4 sm:$0x11]   ;;  %v650_v47 = vshll.u32 %v4156_v44, 16 }
  0xc0   : > { %v4128_v5 = vpop.permute.xlu0 %1794  ;;  %v746_v54 = vshll.u32 %v4141_v24, 16  ;;  %v1767_v46 = vsel %vm574_vm1, %v1762_v45, %v1766_v56  ;;  %v1989_v20 = vsel %vm1985_vm5, %v1956_v33, %v3914_v62  ;;  %v275_v16 = vld [vmem:[%s3430_s19 + $0xb4] sm:$0xf]  ;;  %v744_v62 = vshrl.u32 %v4141_v24, 16 }
  0xc1   : > { %1544 = vrot.lane.b32.xlu1 %v4024_v1, %s3382_s25  ;;  %v2119_v1 = vsel %vm2117_vm9, %v2086_v52, %v4057_v10  ;;  %v2022_v13 = vsel %vm2018_vm6, %v1989_v20, %v3967_v28  ;;  %v751_v9 = vshll.u32 %v4164_v39, 16  ;;  %v4222_v56 = vcombine.low %v275_v16, %v4193_v15 }
  0xc2   : > { %1528 = vrot.lane.b32.xlu0 %v4049_v19, %s3382_s25  ;;  %v2152_v19 = vsel %vm2150_vm10, %v2119_v1, %v1793_v60  ;;  %v2005_v60 = vsel %vm1985_vm5, %v1972_v2, %v3902_v22  ;;  %v2055_v32 = vsel %vm2051_vm7, %v2022_v13, %v3997_v40  ;;  %v748_v28 = vrot.slane %v746_v54, 1 }
  0xc3   : > { %v1937_v34 = vpop.permute.xlu1 %1936  ;;  %v2038_v0 = vsel %vm2018_vm6, %v2005_v60, %v3963_v36  ;;  %v648_v40 = vshrl.u32 %v4156_v44, 16  ;;  %v3033_v2 = vcombine.low %v2889_v42, %v4038_v49  ;;  %v758_v49 = vshll.u32 %v4222_v56, 16  ;;  %v308_v42 = vld [vmem:[%s3430_s19 + $0xb4] sm:$0xe] }
  0xc4   : > { %v1921_v55 = vpop.permute.xlu0 %1920  ;;  %v2201_v58 = vsel %vm2183_vm11, %v2168_v23, %v1937_v34  ;;  %v2071_v36 = vsel %vm2051_vm7, %v2038_v0, %v3991_v7  ;;  %v655_v7 = vshll.u32 %v4173_v26, 16  ;;  %v753_v23 = vrot.slane %v751_v9, 1  ;;  %v4243_v34 = vld [vmem:[%s3430_s19 + $0xbc] ss:$0 sps:$4 sm:$0x11]  }
  0xc5   : > { %1546 = vrot.lane.b32.xlu1 %v4060_v21, %s3382_s25  ;;  %v2185_v10 = vsel %vm2183_vm11, %v2152_v19, %v1921_v55  ;;  %3156 = vmatprep.mubr.msk.bf16.mxu1 %vm2229_vm12, %v2201_v58  ;;  %v1659_v21 = vsel %vm574_vm1, %v1654_v17, %v1658_v18  ;;  %v4205_v17 = vld [vmem:[%s3430_s19 + $0x58] sm:$0xf]  ;;  %v2104_v8 = vsel %vm2084_vm8, %v2071_v36, %v4020_v59  ;;  %v4250_v58 = vld [vmem:[%s3430_s19 + $0x5c] ss:$0 sps:$4 sm:$0x11]   ;;  %v763_v0 = vshll.u32 %v4243_v34, 16 }
  0xc6   : > { %1530 = vrot.lane.b32.xlu0 %v4069_v3, %s3382_s25  ;;  %3140 = vmatprep.mubr.msk.bf16.mxu0 %vm2229_vm12, %v2185_v10  ;;  %v1671_v3 = vsel %vm574_vm1, %v1666_v48, %v1670_v11  ;;  %v2088_v18 = vsel %vm2084_vm8, %v2055_v32, %v4026_v14  ;;  %v2137_v45 = vsel %vm2117_vm9, %v2104_v8, %v4071_v30  ;;  %v652_v14 = vrot.slane %v650_v47, 1  ;;  %v299_v36 = vld [vmem:[%s3430_s19 + $0x48] sm:$0xe] }
  0xc7   : > { %v4187_v22 = vpop.permute.xlu1 %787  ;;  %v2121_v59 = vsel %vm2117_vm9, %v2088_v18, %v4076_v12  ;;  %v4229_v30 = vcombine.low %v259_v27, %v4205_v17  ;;  %v3025_v12 = vcombine.low %v2881_v61, %v4052_v51  ;;  %v1886_v51 = vsel %vm847_vm0, %v1884_v38, %v1885_v6 }
  0xc8   : > { %v4199_v57 = vpop.permute.xlu0 %771  ;;  %v2154_v63 = vsel %vm2150_vm10, %v2121_v59, %v4128_v5  ;;  %v749_v5 = vor.u32 %v748_v28, %v744_v62  ;;  %v653_v19 = vor.u32 %v652_v14, %v648_v40  ;;  %v657_v55 = vrot.slane %v655_v7, 1  ;;  %v300_v40 = vld [vmem:[%s3430_s19 + $0x54] sm:$0xe] }
  0xc9   : > { %1816 = vrot.lane.b32.xlu1 %v1755_v43, %s3383_s26  ;;  %v2170_v43 = vsel %vm2150_vm10, %v2137_v45, %v4121_v37  ;;  %v1910_v37 = vsel %vm847_vm0, %v1908_v31, %v1909_v29  ;;  %v662_v10 = vshll.u32 %v4229_v30, 16  ;;  %v1911_v31 = vrot.slane %v3033_v2, 1  ;;  %v2792_v2 = vld [vmem:[%s3430_s19 + $0xb4] sm:$0xf] }
  0xca   : > { %1800 = vrot.lane.b32.xlu0 %v1659_v21, %s3383_s26  ;;  %v1912_v29 = vrot.slane %v4087_v41, 1  ;;  %v1887_v60 = vrot.slane %v3025_v12, 1  ;;  %v1888_v21 = vrot.slane %v4098_v35, 1  ;;  %v754_v38 = vsel %vm574_vm1, %v749_v5, %v753_v23  ;;  %v307_v35 = vld [vmem:[%s3430_s19 + $0xa8] sm:$0xe] }
  0xcb   : > { %v1939_v52 = vpop.permute.xlu1 %1938  ;;  %v760_v6 = vrot.slane %v758_v49, 1  ;;  %v660_v47 = vshrl.u32 %v4229_v30, 16  ;;  %v664_v16 = vrot.slane %v662_v10, 1  ;;  %v667_v41 = vshll.u32 %v4250_v58, 16  ;;  %v4295_v12 = vld [vmem:[%s3430_s19 + $0xb8] sm:$0xf] }
  0xcc   : > { %v2203_v48 = vsel %vm2183_vm11, %v2170_v43, %v1939_v52  ;;  %v1923_v11 = vpop.permute.xlu0 %1922  ;;  %v1913_v62 = vsel %vm847_vm0, %v1911_v31, %v1912_v29  ;;  %v765_v27 = vrot.slane %v763_v0, 1  ;;  %v2938_v32 = vcombine.low %v307_v35, %v4117_v4  ;;  %v2794_v10 = vld [vmem:[%s3430_s19 + $0xc0] sm:$0xf]  ;;  %v4315_v31 = vld [vmem:[%s3430_s19 + $0xc4] sm:$0xf] }
  0xcd   : > { %v2187_v1 = vsel %vm2183_vm11, %v2154_v63, %v1923_v11  ;;  %1818 = vrot.lane.b32.xlu1 %v1767_v46, %s3383_s26  ;;  %3157 = vmatmul.mubr.msk.bf16.vlgmr.msra.gmra.mrb[0].mxu1 %vm2229_vm12, %v2203_v48  ;;  %v756_v46 = vshrl.u32 %v4222_v56, 16  ;;  %v1889_v28 = vsel %vm847_vm0, %v1887_v60, %v1888_v21  ;;  %v665_v7 = vor.u32 %v664_v16, %v660_v47  ;;  %v2778_v60 = vld [vmem:[%s3430_s19 + $0x60] sm:$0xf]  ;;  %v4321_v21 = vld [vmem:[%s3430_s19 + $0x64] sm:$0xf] }
  0xce   : > { %1802 = vrot.lane.b32.xlu0 %v1671_v3, %s3383_s26  ;;  %3141 = vmatmul.mubr.msk.bf16.vlgmr.msra.gmra.mrb[0].mxu0 %vm2229_vm12, %v2187_v1  ;;  %v658_v3 = vsel %vm574_vm1, %v653_v19, %v657_v55  ;;  %v669_v18 = vrot.slane %v667_v41, 1  ;;  %v2930_v45 = vcombine.low %v299_v36, %v4132_v25  ;;  %v890_v59 = vrot.slane %v2938_v32, 1 }
  0xcf   : > { %v4246_v33 = vpop.permute.xlu1 %789  ;;  %v761_v9 = vor.u32 %v760_v6, %v756_v46  ;;  %v891_v43 = vrot.slane %v4164_v39, 1  ;;  %v2939_v52 = vcombine.low %v308_v42, %v4193_v15  ;;  %v867_v48 = vrot.slane %v4173_v26, 1  ;;  %v4301_v39 = vld [vmem:[%s3430_s19 + $0x58] sm:$0xf] }
  0xd0   : > { %v4253_v54 = vpop.permute.xlu0 %773  ;;  %v670_v25 = vsel %vm574_vm1, %v665_v7, %v669_v18  ;;  %v866_v63 = vrot.slane %v2930_v45, 1  ;;  %v2931_v11 = vcombine.low %v300_v40, %v4205_v17  ;;  %v894_v17 = vrot.slane %v4243_v34, 1  ;;  %v4325_v34 = vld [vmem:[%s3430_s19 + $0xbc] ss:$0 sps:$4 sm:$0x11]  }
  0xd1   : > { %1944 = vrot.lane.b32.xlu1 %v1910_v37, %s3384_s27  ;;  %v766_v4 = vsel %vm574_vm1, %v761_v9, %v765_v27  ;;  %v2776_v37 = vld [vmem:[%s3430_s19 + $0x54] sm:$0xf]  ;;  %v892_v26 = vsel %vm847_vm0, %v890_v59, %v891_v43  ;;  %v893_v15 = vrot.slane %v2939_v52, 1  ;;  %v2954_v5 = vcombine.low %v2792_v2, %v4295_v12  ;;  %v4331_v6 = vld [vmem:[%s3430_s19 + $0x5c] ss:$0 sps:$4 sm:$0x11]  }
  0xd2   : > { %1928 = vrot.lane.b32.xlu0 %v1886_v51, %s3384_s27  ;;  %v868_v49 = vsel %vm847_vm0, %v866_v63, %v867_v48  ;;  %v869_v51 = vrot.slane %v2931_v11, 1  ;;  %v870_v19 = vrot.slane %v4250_v58, 1  ;;  %v2946_v55 = vcombine.low %v2776_v37, %v4301_v39  ;;  %v4344_v27 = vld [vmem:[%s3430_s19 + $0xc8] ss:$0 sps:$4 sm:$0x11]  }
  0xd3   : > { %v4262_v20 = vpop.permute.xlu1 %916  ;;  %v2955_v58 = vcombine.low %v2794_v10, %v4315_v31  ;;  %v1259_v46 = vshll.u32 %v2954_v5, 16  ;;  %v2947_v47 = vcombine.low %v2778_v60, %v4321_v21  ;;  %v1257_v35 = vshrl.u32 %v2954_v5, 16  ;;  %v4349_v45 = vld [vmem:[%s3430_s19 + $0x68] ss:$0 sps:$4 sm:$0x11]  }
  0xd4   : > { %v4268_v13 = vpop.permute.xlu0 %900  ;;  %v1163_v16 = vshll.u32 %v2946_v55, 16  ;;  %v1264_v36 = vshll.u32 %v4325_v34, 16  ;;  %v1168_v9 = vshll.u32 %v4331_v6, 16  ;;  %v1161_v7 = vshrl.u32 %v2946_v55, 16 }
  0xd5   : > { %795 = vrot.lane.b32.xlu1 %v754_v38, %s3379_s22  ;;  %v895_v38 = vsel %vm847_vm0, %v893_v15, %v894_v17  ;;  %v1271_v32 = vshll.u32 %v2955_v58, 16  ;;  %v1175_v42 = vshll.u32 %v2947_v47, 16  ;;  %v1269_v59 = vshrl.u32 %v2955_v58, 16  ;;  %v2826_v15 = vld [vmem:[%s3430_s19 + $0xb4] sm:$0xe] }
  0xd6   : > { %779 = vrot.lane.b32.xlu0 %v658_v3, %s3379_s22  ;;  %v871_v3 = vsel %vm847_vm0, %v869_v51, %v870_v19  ;;  %v1165_v18 = vrot.slane %v1163_v16, 1  ;;  %v1170_v52 = vrot.slane %v1168_v9, 1  ;;  %v1276_v63 = vshll.u32 %v4344_v27, 16 }
  0xd7   : > { %v4275_v8 = vpop.permute.xlu1 %918  ;;  %v1173_v2 = vshrl.u32 %v2947_v47, 16  ;;  %v1177_v37 = vrot.slane %v1175_v42, 1  ;;  %v1403_v9 = vrot.slane %v4325_v34, 1  ;;  %v2858_v34 = vld [vmem:[%s3430_s19 + $0xcc] sm:$0xf] }
  0xd8   : > { %v4280_v61 = vpop.permute.xlu0 %902  ;;  %v1166_v11 = vor.u32 %v1165_v18, %v1161_v7  ;;  %v1278_v19 = vrot.slane %v1276_v63, 1  ;;  %v4386_v7 = vld [vmem:[%s3430_s19 + $0x64] sm:$0xf]  ;;  %v4400_v63 = vld [vmem:[%s3430_s19 + $0xd0] sm:$0xf] }
  0xd9   : > { %1946 = vrot.lane.b32.xlu1 %v1913_v62, %s3384_s27  ;;  %v1261_v62 = vrot.slane %v1259_v46, 1 }
  0xda   : > { %1930 = vrot.lane.b32.xlu0 %v1889_v28, %s3384_s27  ;;  %v1171_v60 = vsel %vm574_vm1, %v1166_v11, %v1170_v52 }
  0xdb   : > { %v4288_v14 = vpop.permute.xlu1 %1028  ;;  %v1262_v43 = vor.u32 %v1261_v62, %v1257_v35  ;;  %v2856_v35 = vld [vmem:[%s3430_s19 + $0xc0] sm:$0xf] }
  0xdc   : > { %v4297_v1 = vpop.permute.xlu0 %1012 }
  0xdd   : > { %797 = vrot.lane.b32.xlu1 %v766_v4, %s3379_s22  ;;  %v1266_v4 = vrot.slane %v1264_v36, 1  ;;  %v4378_v36 = vld [vmem:[%s3430_s19 + $0xc4] sm:$0xf] }
  0xde   : > { %781 = vrot.lane.b32.xlu0 %v670_v25, %s3379_s22  ;;  %v1273_v25 = vrot.slane %v1271_v32, 1  ;;  %v2840_v32 = vld [vmem:[%s3430_s19 + $0x60] sm:$0xf] }
  0xdf   : > { %v4308_v23 = vpop.permute.xlu1 %1030 }
  0xe0   : > { %v4317_v29 = vpop.permute.xlu0 %1014  ;;  %v1274_v51 = vor.u32 %v1273_v25, %v1269_v59  ;;  %v1379_v59 = vrot.slane %v4331_v6, 1  ;;  %v3002_v25 = vcombine.low %v2856_v35, %v4378_v36 }
  0xe1   : > { %924 = vrot.lane.b32.xlu1 %v892_v26, %s3378_s21  ;;  %v1180_v26 = vshll.u32 %v4349_v45, 16 }
  0xe2   : > { %908 = vrot.lane.b32.xlu0 %v868_v49, %s3378_s21  ;;  %v1267_v49 = vsel %vm574_vm1, %v1262_v43, %v1266_v4 }
  0xe3   : > { %v4333_v0 = vpop.permute.xlu1 %1300  ;;  %v1182_v46 = vrot.slane %v1180_v26, 1 }
  0xe4   : > { %v4337_v41 = vpop.permute.xlu0 %1284 }
  0xe5   : > { %926 = vrot.lane.b32.xlu1 %v895_v38, %s3378_s21  ;;  %v1178_v38 = vor.u32 %v1177_v37, %v1173_v2 }
  0xe6   : > { %910 = vrot.lane.b32.xlu0 %v871_v3, %s3378_s21 }
  0xe7   : > { %v4346_v28 = vpop.permute.xlu1 %1302  ;;  %v1183_v42 = vsel %vm574_vm1, %v1178_v38, %v1182_v46  ;;  %v4428_v46 = vld [vmem:[%s3430_s19 + $0xd4] ss:$0 sps:$4 sm:$0x11]  }
  0xe8   : > { %v4351_v40 = vpop.permute.xlu0 %1286 }
  0xe9   : > { %1036 = vrot.lane.b32.xlu1 %v2954_v5, %s3377_s20  ;;  %v2818_v5 = vld [vmem:[%s3430_s19 + $0x54] sm:$0xe] }
  0xea   : > { %1020 = vrot.lane.b32.xlu0 %v2946_v55, %s3377_s20  ;;  %v2986_v55 = vcombine.low %v2826_v15, %v4295_v12  ;;  %v2978_v3 = vcombine.low %v2818_v5, %v4301_v39  ;;  %v1279_v12 = vsel %vm574_vm1, %v1274_v51, %v1278_v19  ;;  %v1382_v15 = vrot.slane %v4349_v45, 1  ;;  %v4410_v5 = vld [vmem:[%s3430_s19 + $0xc8] ss:$0 sps:$4 sm:$0x11]   ;;  %v2842_v19 = vld [vmem:[%s3430_s19 + $0x6c] sm:$0xf] }
  0xeb   : > { %v4356_v48 = vpop.permute.xlu1 %1428  ;;  %v4415_v51 = vcombine.low %v2858_v34, %v4400_v63  ;;  %v1776_v35 = vshll.u32 %v4410_v5, 16 }
  0xec   : > { %v4360_v17 = vpop.permute.xlu0 %1412  ;;  %v1402_v62 = vrot.slane %v2986_v55, 1  ;;  %v1378_v4 = vrot.slane %v2978_v3, 1  ;;  %v4419_v55 = vld [vmem:[%s3430_s19 + $0x70] sm:$0xf] }
  0xed   : > { %1038 = vrot.lane.b32.xlu1 %v2955_v58, %s3377_s20  ;;  %v2827_v58 = vld [vmem:[%s3430_s19 + $0xc0] sm:$0xe] }
  0xee   : > { %1022 = vrot.lane.b32.xlu0 %v2947_v47, %s3377_s20  ;;  %v2819_v47 = vld [vmem:[%s3430_s19 + $0x60] sm:$0xe]  ;;  %v2987_v39 = vcombine.low %v2827_v58, %v4315_v31  ;;  %v2994_v31 = vcombine.low %v2840_v32, %v4386_v7  ;;  %v1404_v6 = vsel %vm847_vm0, %v1402_v62, %v1403_v9  ;;  %v1380_v37 = vsel %vm847_vm0, %v1378_v4, %v1379_v59 }
  0xef   : > { %v4367_v10 = vpop.permute.xlu1 %1430  ;;  %v2979_v43 = vcombine.low %v2819_v47, %v4321_v21  ;;  %v1406_v21 = vrot.slane %v4344_v27, 1  ;;  %v4423_v27 = vld [vmem:[%s3430_s19 + $0x68] ss:$0 sps:$4 sm:$0x11]   ;;  %v4432_v47 = vcombine.low %v2842_v19, %v4419_v55  ;;  %v1769_v62 = vshrl.u32 %v3002_v25, 16 }
  0xf0   : > { %v4372_v16 = vpop.permute.xlu0 %1414  ;;  %v1405_v11 = vrot.slane %v2987_v39, 1  ;;  %v1675_v38 = vshll.u32 %v2994_v31, 16  ;;  %v1783_v39 = vshll.u32 %v4415_v51, 16  ;;  %v1974_v32 = vsel %vm1952_vm4, %v3615_v50, %v4187_v22  ;;  %v4450_v50 = vld [vmem:[%s3430_s19 + $0x74] ss:$0 sps:$4 sm:$0x11]  }
  0xf1   : > { %1308 = vrot.lane.b32.xlu1 %v1267_v49, %s3380_s23  ;;  %v1381_v26 = vrot.slane %v2979_v43, 1  ;;  %v1680_v59 = vshll.u32 %v4423_v27, 16  ;;  %v1958_v43 = vsel %vm1952_vm4, %v3618_v53, %v4199_v57  ;;  %v2007_v34 = vsel %vm1985_vm5, %v1974_v32, %v4262_v20 }
  0xf2   : > { %1292 = vrot.lane.b32.xlu0 %v1171_v60, %s3380_s23  ;;  %v1771_v60 = vshll.u32 %v3002_v25, 16  ;;  %v1407_v45 = vsel %vm847_vm0, %v1405_v11, %v1406_v21  ;;  %v1677_v4 = vrot.slane %v1675_v38, 1  ;;  %v1788_v11 = vshll.u32 %v4428_v46, 16 }
  0xf3   : > { %v4388_v18 = vpop.permute.xlu1 %1540  ;;  %v1383_v58 = vsel %vm847_vm0, %v1381_v26, %v1382_v15  ;;  %v1991_v22 = vsel %vm1985_vm5, %v1958_v43, %v4268_v13  ;;  %v2040_v21 = vsel %vm2018_vm6, %v2007_v34, %v4288_v14  ;;  %v1778_v53 = vrot.slane %v1776_v35, 1 }
  0xf4   : > { %v4393_v52 = vpop.permute.xlu0 %1524  ;;  %v1773_v9 = vrot.slane %v1771_v60, 1  ;;  %v1687_v57 = vshll.u32 %v4432_v47, 16  ;;  %v2024_v20 = vsel %vm2018_vm6, %v1991_v22, %v4297_v1  ;;  %v2073_v26 = vsel %vm2051_vm7, %v2040_v21, %v4333_v0 }
  0xf5   : > { %1310 = vrot.lane.b32.xlu1 %v1279_v12, %s3380_s23  ;;  %v1785_v60 = vrot.slane %v1783_v39, 1  ;;  %v2057_v13 = vsel %vm2051_vm7, %v2024_v20, %v4337_v41  ;;  %v2106_v14 = vsel %vm2084_vm8, %v2073_v26, %v4356_v48  ;;  %v1692_v35 = vshll.u32 %v4450_v50, 16  ;;  %v2890_v41 = vld [vmem:[%s3430_s19 + $0xc0] sm:$0xe] }
  0xf6   : > { %1294 = vrot.lane.b32.xlu0 %v1183_v42, %s3380_s23  ;;  %v1673_v42 = vshrl.u32 %v2994_v31, 16  ;;  %v1774_v19 = vor.u32 %v1773_v9, %v1769_v62  ;;  %v2090_v1 = vsel %vm2084_vm8, %v2057_v13, %v4360_v17  ;;  %v2139_v0 = vsel %vm2117_vm9, %v2106_v14, %v4388_v18 }
  0xf7   : > { %v4405_v2 = vpop.permute.xlu1 %1542  ;;  %v2123_v48 = vsel %vm2117_vm9, %v2090_v1, %v4393_v52  ;;  %v1685_v9 = vshrl.u32 %v4432_v47, 16  ;;  %v1689_v39 = vrot.slane %v1687_v57, 1  ;;  %v1915_v26 = vrot.slane %v4410_v5, 1 }
  0xf8   : > { %v4412_v49 = vpop.permute.xlu0 %1526  ;;  %v1678_v38 = vor.u32 %v1677_v4, %v1673_v42  ;;  %v2882_v4 = vld [vmem:[%s3430_s19 + $0x60] sm:$0xe] }
  0xf9   : > { %1436 = vrot.lane.b32.xlu1 %v1404_v6, %s3381_s24  ;;  %v1781_v6 = vshrl.u32 %v4415_v51, 16  ;;  %v3026_v21 = vcombine.low %v2882_v4, %v4386_v7 }
  0xfa   : > { %1420 = vrot.lane.b32.xlu0 %v1380_v37, %s3381_s24 }
  0xfb   : > { %v1813_v3 = vpop.permute.xlu1 %1812  ;;  %v1786_v42 = vor.u32 %v1785_v60, %v1781_v6 }
  0xfc   : > { %v1797_v12 = vpop.permute.xlu0 %1796 }
  0xfd   : > { %1438 = vrot.lane.b32.xlu1 %v1407_v45, %s3381_s24  ;;  %v1682_v45 = vrot.slane %v1680_v59, 1  ;;  %v2156_v17 = vsel %vm2150_vm10, %v2123_v48, %v1797_v12  ;;  %v4769_v59 = vld [vmem:[#allocation2_spill] sm:$0xff]  ;;  %v4770_v12 = vld [vmem:[#allocation3_spill] sm:$0xff] }
  0xfe   : > { %1422 = vrot.lane.b32.xlu0 %v1383_v58, %s3381_s24  ;;  %v1790_v58 = vrot.slane %v1788_v11, 1  ;;  %v1976_v43 = vsel %vm1952_vm4, %v4769_v59, %v4246_v33  ;;  %v1960_v34 = vsel %vm1952_vm4, %v4770_v12, %v4253_v54  ;;  %v1694_v11 = vrot.slane %v1692_v35, 1 }
  0xff   : > { %v4456_v37 = vpop.permute.xlu1 %1814  ;;  %v2009_v6 = vsel %vm1985_vm5, %v1976_v43, %v4275_v8  ;;  %v1683_v33 = vsel %vm574_vm1, %v1678_v38, %v1682_v45  ;;  %v1690_v54 = vor.u32 %v1689_v39, %v1685_v9  ;;  %v2891_v8 = vld [vmem:[%s3430_s19 + $0xcc] sm:$0xe]  ;;  %v1890_v38 = vrot.slane %v3026_v21, 1  ;;  %v4772_v21 = vld [vmem:[#allocation5_spill] sm:$0xff] }
 0x100   : > { %v4463_v15 = vpop.permute.xlu0 %1798  ;;  %v3035_v5 = vcombine.low %v2891_v8, %v4400_v63 }
 0x101   : > { %1548 = vrot.lane.b32.xlu1 %v3002_v25, %s3382_s25  ;;  %v2172_v25 = vsel %vm2150_vm10, %v2139_v0, %v1813_v3  ;;  %v3034_v3 = vcombine.low %v2890_v41, %v4378_v36  ;;  %v2042_v36 = vsel %vm2018_vm6, %v2009_v6, %v4308_v23 }
 0x102   : > { %1532 = vrot.lane.b32.xlu0 %v2994_v31, %s3382_s25  ;;  %v1779_v31 = vsel %vm574_vm1, %v1774_v19, %v1778_v53  ;;  %v2883_v53 = vld [vmem:[%s3430_s19 + $0x6c] sm:$0xe]  ;;  %v2075_v57 = vsel %vm2051_vm7, %v2042_v36, %v4346_v28  ;;  %v4771_v36 = vld [vmem:[#allocation4_spill] sm:$0xff] }
 0x103   : > { %v1941_v62 = vpop.permute.xlu1 %1940  ;;  %v2108_v7 = vsel %vm2084_vm8, %v2075_v57, %v4367_v10  ;;  %v1914_v19 = vrot.slane %v3034_v3, 1 }
 0x104   : > { %v2205_v32 = vsel %vm2183_vm11, %v2172_v25, %v1941_v62  ;;  %v1925_v18 = vpop.permute.xlu0 %1924  ;;  %v2141_v60 = vsel %vm2117_vm9, %v2108_v7, %v4405_v2 }
 0x105   : > { %v2189_v52 = vsel %vm2183_vm11, %v2156_v17, %v1925_v18  ;;  %1550 = vrot.lane.b32.xlu1 %v4415_v51, %s3382_s25  ;;  %3160 = vmatprep.mubr.msk.bf16.mxu1 %vm2229_vm12, %v2205_v32  ;;  %v1993_v51 = vsel %vm1985_vm5, %v1960_v34, %v4280_v61  ;;  %v1791_v61 = vsel %vm574_vm1, %v1786_v42, %v1790_v58  ;;  %v1894_v58 = vrot.slane %v4450_v50, 1 }
 0x106   : > { %1534 = vrot.lane.b32.xlu0 %v4432_v47, %s3382_s25  ;;  %3144 = vmatprep.mubr.msk.bf16.mxu0 %vm2229_vm12, %v2189_v52  ;;  %v2026_v47 = vsel %vm2018_vm6, %v1993_v51, %v4317_v29  ;;  %v1891_v29 = vrot.slane %v4423_v27, 1  ;;  %v2174_v13 = vsel %vm2150_vm10, %v2141_v60, %v4456_v37  ;;  %v1695_v27 = vsel %vm574_vm1, %v1690_v54, %v1694_v11 }
 0x107   : > { %v4506_v22 = vpop.permute.xlu1 %791  ;;  %v2059_v23 = vsel %vm2051_vm7, %v2026_v47, %v4351_v40  ;;  %v3027_v40 = vcombine.low %v2883_v53, %v4419_v55  ;;  %v1917_v55 = vrot.slane %v3035_v5, 1  ;;  %v1918_v37 = vrot.slane %v4428_v46, 1 }
 0x108   : > { %v4515_v20 = vpop.permute.xlu0 %775  ;;  %v2092_v28 = vsel %vm2084_vm8, %v2059_v23, %v4372_v16  ;;  %v1978_v54 = vsel %vm1952_vm4, %v4771_v36, %v4506_v22 }
 0x109   : > { %1820 = vrot.lane.b32.xlu1 %v1779_v31, %s3383_s26  ;;  %v2125_v10 = vsel %vm2117_vm9, %v2092_v28, %v4412_v49  ;;  %v1916_v49 = vsel %vm847_vm0, %v1914_v19, %v1915_v26  ;;  %v1893_v0 = vrot.slane %v3027_v40, 1  ;;  %v1919_v41 = vsel %vm847_vm0, %v1917_v55, %v1918_v37 }
 0x10a   : > { %1804 = vrot.lane.b32.xlu0 %v1683_v33, %s3383_s26  ;;  %v2158_v16 = vsel %vm2150_vm10, %v2125_v10, %v4463_v15  ;;  %v1892_v15 = vsel %vm847_vm0, %v1890_v38, %v1891_v29  ;;  %v1962_v8 = vsel %vm1952_vm4, %v4772_v21, %v4515_v20 }
 0x10b   : > { %v1943_v14 = vpop.permute.xlu1 %1942  ;;  %v1895_v25 = vsel %vm847_vm0, %v1893_v0, %v1894_v58 }
 0x10c   : > { %v2207_v2 = vsel %vm2183_vm11, %v2174_v13, %v1943_v14  ;;  %v1927_v45 = vpop.permute.xlu0 %1926  ;;  %v4773_v14 = vld [vmem:[#allocation6_spill] sm:$0xff] }
 0x10d   : > { %v2191_v63 = vsel %vm2183_vm11, %v2158_v16, %v1927_v45  ;;  %1822 = vrot.lane.b32.xlu1 %v1791_v61, %s3383_s26  ;;  %3161 = vmatmul.mubr.msk.bf16.gmra.mrb[4].mxu1 %vm2229_vm12, %v2207_v2  ;;  %v4774_v16 = vld [vmem:[#allocation7_spill] sm:$0xff] }
 0x10e   : > { %1806 = vrot.lane.b32.xlu0 %v1695_v27, %s3383_s26  ;;  %3145 = vmatmul.mubr.msk.bf16.gmra.mrb[4].mxu0 %vm2229_vm12, %v2191_v63 }
 0x10f   : > { %v794_v1 = vpop.permute.xlu1 %793 }
 0x110   : > { %v778_v35 = vpop.permute.xlu0 %777  ;;  %v1980_v27 = vsel %vm1952_vm4, %v4773_v14, %v794_v1 }
 0x111   : > { %1948 = vrot.lane.b32.xlu1 %v1916_v49, %s3384_s27  ;;  %v1964_v2 = vsel %vm1952_vm4, %v4774_v16, %v778_v35 }
 0x112   : > { %1932 = vrot.lane.b32.xlu0 %v1892_v15, %s3384_s27 }
 0x113   : > { %v921_v48 = vpop.permute.xlu1 %920 }
 0x114   : > { %v905_v62 = vpop.permute.xlu0 %904  ;;  %v2011_v53 = vsel %vm1985_vm5, %v1978_v54, %v921_v48 }
 0x115   : > { %1950 = vrot.lane.b32.xlu1 %v1919_v41, %s3384_s27  ;;  %v1995_v47 = vsel %vm1985_vm5, %v1962_v8, %v905_v62 }
 0x116   : > { %1934 = vrot.lane.b32.xlu0 %v1895_v25, %s3384_s27 }
 0x117   : > { %v923_v46 = vpop.permute.xlu1 %922 }
 0x118   : > { %v907_v9 = vpop.permute.xlu0 %906  ;;  %v2013_v45 = vsel %vm1985_vm5, %v1980_v27, %v923_v46 }
 0x119   : > { %v1997_v63 = vsel %vm1985_vm5, %v1964_v2, %v907_v9 }
 0x11b   : > { %v1033_v39 = vpop.permute.xlu1 %1032 }
 0x11c   : > { %v1017_v17 = vpop.permute.xlu0 %1016  ;;  %v2044_v57 = vsel %vm2018_vm6, %v2011_v53, %v1033_v39 }
 0x11d   : > { %v2028_v26 = vsel %vm2018_vm6, %v1995_v47, %v1017_v17 }
 0x11f   : > { %v1035_v50 = vpop.permute.xlu1 %1034 }
 0x120   : > { %v1019_v32 = vpop.permute.xlu0 %1018  ;;  %v2046_v49 = vsel %vm2018_vm6, %v2013_v45, %v1035_v50 }
 0x121   : > { %v2030_v37 = vsel %vm2018_vm6, %v1997_v63, %v1019_v32 }
 0x123   : > { %v1305_v18 = vpop.permute.xlu1 %1304 }
 0x124   : > { %v1289_v31 = vpop.permute.xlu0 %1288  ;;  %v2077_v23 = vsel %vm2051_vm7, %v2044_v57, %v1305_v18 }
 0x125   : > { %v2061_v19 = vsel %vm2051_vm7, %v2028_v26, %v1289_v31 }
 0x127   : > { %v1307_v42 = vpop.permute.xlu1 %1306 }
 0x128   : > { %v1291_v4 = vpop.permute.xlu0 %1290  ;;  %v2079_v1 = vsel %vm2051_vm7, %v2046_v49, %v1307_v42 }
 0x129   : > { %v2063_v0 = vsel %vm2051_vm7, %v2030_v37, %v1291_v4 }
 0x12b   : > { %v1433_v59 = vpop.permute.xlu1 %1432 }
 0x12c   : > { %v1417_v43 = vpop.permute.xlu0 %1416  ;;  %v2110_v22 = vsel %vm2084_vm8, %v2077_v23, %v1433_v59 }
 0x12d   : > { %v2094_v29 = vsel %vm2084_vm8, %v2061_v19, %v1417_v43 }
 0x12f   : > { %v1435_v52 = vpop.permute.xlu1 %1434 }
 0x130   : > { %v1419_v3 = vpop.permute.xlu0 %1418  ;;  %v2112_v58 = vsel %vm2084_vm8, %v2079_v1, %v1435_v52 }
 0x131   : > { %v2096_v35 = vsel %vm2084_vm8, %v2063_v0, %v1419_v3 }
 0x133   : > { %v1545_v12 = vpop.permute.xlu1 %1544 }
 0x134   : > { %v1529_v34 = vpop.permute.xlu0 %1528  ;;  %v2143_v20 = vsel %vm2117_vm9, %v2110_v22, %v1545_v12 }
 0x135   : > { %v2127_v28 = vsel %vm2117_vm9, %v2094_v29, %v1529_v34 }
 0x137   : > { %v1547_v6 = vpop.permute.xlu1 %1546 }
 0x138   : > { %v1531_v33 = vpop.permute.xlu0 %1530  ;;  %v2145_v41 = vsel %vm2117_vm9, %v2112_v58, %v1547_v6 }
 0x139   : > { %v2129_v48 = vsel %vm2117_vm9, %v2096_v35, %v1531_v33 }
 0x13b   : > { %v1817_v11 = vpop.permute.xlu1 %1816 }
 0x13c   : > { %v1801_v51 = vpop.permute.xlu0 %1800  ;;  %v2176_v60 = vsel %vm2150_vm10, %v2143_v20, %v1817_v11 }
 0x13d   : > { %v2160_v40 = vsel %vm2150_vm10, %v2127_v28, %v1801_v51 }
 0x13f   : > { %v1819_v61 = vpop.permute.xlu1 %1818 }
 0x140   : > { %v1803_v7 = vpop.permute.xlu0 %1802  ;;  %v2178_v25 = vsel %vm2150_vm10, %v2145_v41, %v1819_v61 }
 0x141   : > { %v2162_v46 = vsel %vm2150_vm10, %v2129_v48, %v1803_v7 }
 0x143   : > { %v1945_v5 = vpop.permute.xlu1 %1944 }
 0x144   : > { %v2209_v10 = vsel %vm2183_vm11, %v2176_v60, %v1945_v5  ;;  %v1929_v13 = vpop.permute.xlu0 %1928 }
 0x145   : > { %v2193_v38 = vsel %vm2183_vm11, %v2160_v40, %v1929_v13  ;;  %3164 = vmatprep.mubr.msk.bf16.mxu1 %vm2229_vm12, %v2209_v10 }
 0x146   : > { %3148 = vmatprep.mubr.msk.bf16.mxu0 %vm2229_vm12, %v2193_v38 }
 0x147   : > { %v796_v55 = vpop.permute.xlu1 %795 }
 0x148   : > { %v780_v15 = vpop.permute.xlu0 %779  ;;  %v1982_v26 = vsel %vm1952_vm4, %v4141_v24, %v796_v55 }
 0x149   : > { %v1966_v23 = vsel %vm1952_vm4, %v4156_v44, %v780_v15 }
 0x14b   : > { %v1947_v62 = vpop.permute.xlu1 %1946 }
 0x14c   : > { %v2211_v9 = vsel %vm2183_vm11, %v2178_v25, %v1947_v62  ;;  %v1931_v39 = vpop.permute.xlu0 %1930 }
 0x14d   : > { %v2195_v17 = vsel %vm2183_vm11, %v2162_v46, %v1931_v39  ;;  %3165 = vmatmul.mubr.msk.bf16.gmra.mrb[8].mxu1 %vm2229_vm12, %v2211_v9  ;;  %v4640_v39 = vld [vmem:[%s4755_s2] ss:$0 sm:$0xff] }
 0x14e   : > { %3149 = vmatmul.mubr.msk.bf16.gmra.mrb[8].mxu0 %vm2229_vm12, %v2195_v17 }
 0x14f   : > { %v798_v50 = vpop.permute.xlu1 %797 }
 0x150   : > { %v782_v32 = vpop.permute.xlu0 %781  ;;  %v1984_v5 = vsel %vm1952_vm4, %v4222_v56, %v798_v50 }
 0x151   : > { %v1968_v44 = vsel %vm1952_vm4, %v4229_v30, %v782_v32 }
 0x153   : > { %v925_v18 = vpop.permute.xlu1 %924 }
 0x154   : > { %v909_v31 = vpop.permute.xlu0 %908  ;;  %v2015_v7 = vsel %vm1985_vm5, %v1982_v26, %v925_v18 }
 0x155   : > { %v1999_v19 = vsel %vm1985_vm5, %v1966_v23, %v909_v31 }
 0x157   : > { %v927_v42 = vpop.permute.xlu1 %926 }
 0x158   : > { %v911_v4 = vpop.permute.xlu0 %910  ;;  %v2017_v10 = vsel %vm1985_vm5, %v1984_v5, %v927_v42 }
 0x159   : > { %v2001_v27 = vsel %vm1985_vm5, %v1968_v44, %v911_v4 }
 0x15b   : > { %v1037_v59 = vpop.permute.xlu1 %1036 }
 0x15c   : > { %v1021_v43 = vpop.permute.xlu0 %1020  ;;  %v2048_v22 = vsel %vm2018_vm6, %v2015_v7, %v1037_v59 }
 0x15d   : > { %v2032_v20 = vsel %vm2018_vm6, %v1999_v19, %v1021_v43 }
 0x15f   : > { %v1039_v52 = vpop.permute.xlu1 %1038 }
 0x160   : > { %v1023_v3 = vpop.permute.xlu0 %1022  ;;  %v2050_v38 = vsel %vm2018_vm6, %v2017_v10, %v1039_v52 }
 0x161   : > { %v2034_v45 = vsel %vm2018_vm6, %v2001_v27, %v1023_v3 }
 0x163   : > { %v1309_v12 = vpop.permute.xlu1 %1308 }
 0x164   : > { %v1293_v34 = vpop.permute.xlu0 %1292  ;;  %v2081_v28 = vsel %vm2051_vm7, %v2048_v22, %v1309_v12 }
 0x165   : > { %v2065_v24 = vsel %vm2051_vm7, %v2032_v20, %v1293_v34 }
 0x167   : > { %v1311_v6 = vpop.permute.xlu1 %1310 }
 0x168   : > { %v1295_v33 = vpop.permute.xlu0 %1294  ;;  %v2083_v63 = vsel %vm2051_vm7, %v2050_v38, %v1311_v6 }
 0x169   : > { %v2067_v37 = vsel %vm2051_vm7, %v2034_v45, %v1295_v33 }
 0x16b   : > { %v1437_v11 = vpop.permute.xlu1 %1436 }
 0x16c   : > { %v1421_v51 = vpop.permute.xlu0 %1420  ;;  %v2114_v40 = vsel %vm2084_vm8, %v2081_v28, %v1437_v11 }
 0x16d   : > { %v2098_v13 = vsel %vm2084_vm8, %v2065_v24, %v1421_v51 }
 0x16f   : > { %v1439_v36 = vpop.permute.xlu1 %1438 }
 0x170   : > { %v1423_v54 = vpop.permute.xlu0 %1422  ;;  %v2116_v1 = vsel %vm2084_vm8, %v2083_v63, %v1439_v36 }
 0x171   : > { %v2100_v0 = vsel %vm2084_vm8, %v2067_v37, %v1423_v54 }
 0x173   : > { %v1549_v21 = vpop.permute.xlu1 %1548 }
 0x174   : > { %v1533_v8 = vpop.permute.xlu0 %1532  ;;  %v2147_v14 = vsel %vm2117_vm9, %v2114_v40, %v1549_v21 }
 0x175   : > { %v2131_v16 = vsel %vm2117_vm9, %v2098_v13, %v1533_v8 }
 0x177   : > { %v1551_v53 = vpop.permute.xlu1 %1550 }
 0x178   : > { %v1535_v47 = vpop.permute.xlu0 %1534  ;;  %v2149_v58 = vsel %vm2117_vm9, %v2116_v1, %v1551_v53 }
 0x179   : > { %v2133_v35 = vsel %vm2117_vm9, %v2100_v0, %v1535_v47 }
 0x17b   : > { %v1821_v57 = vpop.permute.xlu1 %1820 }
 0x17c   : > { %v1805_v61 = vpop.permute.xlu0 %1804  ;;  %v2180_v56 = vsel %vm2150_vm10, %v2147_v14, %v1821_v57 }
 0x17d   : > { %v2164_v30 = vsel %vm2150_vm10, %v2131_v16, %v1805_v61 }
 0x17f   : > { %v1823_v29 = vpop.permute.xlu1 %1822 }
 0x180   : > { %v1807_v60 = vpop.permute.xlu0 %1806  ;;  %v2182_v41 = vsel %vm2150_vm10, %v2149_v58, %v1823_v29 }
 0x181   : > { %v2166_v25 = vsel %vm2150_vm10, %v2133_v35, %v1807_v60 }
 0x183   : > { %v1949_v2 = vpop.permute.xlu1 %1948 }
 0x184   : > { %v2213_v49 = vsel %vm2183_vm11, %v2180_v56, %v1949_v2  ;;  %v1933_v55 = vpop.permute.xlu0 %1932 }
 0x185   : > { %v2197_v15 = vsel %vm2183_vm11, %v2164_v30, %v1933_v55  ;;  %3168 = vmatprep.mubr.msk.bf16.mxu1 %vm2229_vm12, %v2213_v49 }
 0x186   : > { %3152 = vmatprep.mubr.msk.bf16.mxu0 %vm2229_vm12, %v2197_v15 }
 0x187   : > { %v1951_v48 = vpop.permute.xlu1 %1950 }
 0x188   : > { %v2215_v62 = vsel %vm2183_vm11, %v2182_v41, %v1951_v48  ;;  %v1935_v46 = vpop.permute.xlu0 %1934 }
 0x189   : > { %v2199_v9 = vsel %vm2183_vm11, %v2166_v25, %v1935_v46  ;;  %3169 = vmatmul.mubr.msk.bf16.gmra.mrb[12].mxu1 %vm2229_vm12, %v2215_v62 }
 0x18a   : > { %3153 = vmatmul.mubr.msk.bf16.gmra.mrb[12].mxu0 %vm2229_vm12, %v2199_v9 }
 0x1a0   : > { %v3158_v17 = vpop.f32.mrb[0].mxu1 }
 0x1a1   : > { %v3142_v50 = vpop.f32.mrb[0].mxu0  ;;  %v2376_v32 = vadd.f32 %v3158_v17, %v4640_v39  ;;  %v2367_v18 = vpop.f32.mrb[1].mxu1 }
 0x1a2   : > { %v2312_v31 = vadd.f32 %v3142_v50, %v4640_v39  ;;  %v2303_v42 = vpop.f32.mrb[1].mxu0  ;;  %v2368_v4 = vadd.f32 %v4640_v39, %v2367_v18  ;;  %v3159_v59 = vpop.f32.mrb[2].mxu1 }
 0x1a3   : > { %v2448_v43 = vmax.f32 %v2376_v32, 0.0  ;;  %v2304_v52 = vadd.f32 %v4640_v39, %v2303_v42  ;;  %v3143_v3 = vpop.f32.mrb[2].mxu0  ;;  %v2379_v12 = vadd.f32 %v3159_v59, %v4640_v39  ;;  %v2370_v34 = vpop.f32.mrb[3].mxu1 }
 0x1a4   : > { %v2432_v6 = vmax.f32 %v2312_v31, 0.0  ;;  %v2446_v33 = vmax.f32 %v2368_v4, 0.0  ;;  %v2315_v11 = vadd.f32 %v3143_v3, %v4640_v39  ;;  %v2306_v51 = vpop.f32.mrb[3].mxu0  ;;  %v2371_v36 = vadd.f32 %v4640_v39, %v2370_v34 }
 0x1a5   : > { %v3107_v54 = vpack.c.bf16 %v2448_v43, %v2448_v43  ;;  %v2430_v21 = vmax.f32 %v2304_v52, 0.0  ;;  %v2449_v8 = vmax.f32 %v2379_v12, 0.0  ;;  %v2307_v53 = vadd.f32 %v4640_v39, %v2306_v51 }
 0x1a6   : > { %v3091_v47 = vpack.c.bf16 %v2432_v6, %v2432_v6  ;;  %v3105_v57 = vpack.c.bf16 %v2446_v33, %v2446_v33  ;;  %v2433_v61 = vmax.f32 %v2315_v11, 0.0  ;;  %v2447_v26 = vmax.f32 %v2371_v36, 0.0 }
 0x1a7   : > { %2609 = vst.msk [vmem:[%s4651_s8 + $0x48] sm:$0xf] %vm2590_vm13, %v3107_v54  ;;  %v3089_v23 = vpack.c.bf16 %v2430_v21, %v2430_v21  ;;  %v3108_v7 = vpack.c.bf16 %v2449_v8, %v2449_v8  ;;  %v2431_v19 = vmax.f32 %v2307_v53, 0.0 }
 0x1a8   : > { %2593 = vst.msk [vmem:[%s4651_s8 + $0x8] sm:$0xf] %vm2590_vm13, %v3091_v47  ;;  %2607 = vst.msk [vmem:[%s4651_s8 + $0x40] sm:$0xf] %vm2590_vm13, %v3105_v57  ;;  %v3092_v22 = vpack.c.bf16 %v2433_v61, %v2433_v61  ;;  %v3106_v29 = vpack.c.bf16 %v2447_v26, %v2447_v26 }
 0x1a9   : > { %2591 = vst.msk [vmem:[%s4651_s8] sm:$0xf] %vm2590_vm13, %v3089_v23  ;;  %2610 = vst.msk [vmem:[%s4651_s8 + $0x4c] sm:$0xf] %vm2590_vm13, %v3108_v7  ;;  %v3090_v20 = vpack.c.bf16 %v2431_v19, %v2431_v19 }
 0x1aa   : > { %2594 = vst.msk [vmem:[%s4651_s8 + $0xc] sm:$0xf] %vm2590_vm13, %v3092_v22  ;;  %2608 = vst.msk [vmem:[%s4651_s8 + $0x44] sm:$0xf] %vm2590_vm13, %v3106_v29 }
 0x1ab   : > { %2592 = vst.msk [vmem:[%s4651_s8 + $0x4] sm:$0xf] %vm2590_vm13, %v3090_v20 }
 0x1e0   : > { %v3162_v28 = vpop.f32.mrb[4].mxu1 }
 0x1e1   : > { %v3146_v60 = vpop.f32.mrb[4].mxu0  ;;  %v2392_v5 = vadd.f32 %v3162_v28, %v4640_v39  ;;  %v2383_v24 = vpop.f32.mrb[5].mxu1 }
 0x1e2   : > { %v2328_v40 = vadd.f32 %v3146_v60, %v4640_v39  ;;  %v2319_v44 = vpop.f32.mrb[5].mxu0  ;;  %v2384_v10 = vadd.f32 %v4640_v39, %v2383_v24  ;;  %v3163_v13 = vpop.f32.mrb[6].mxu1 }
 0x1e3   : > { %v2452_v14 = vmax.f32 %v2392_v5, 0.0  ;;  %v2320_v27 = vadd.f32 %v4640_v39, %v2319_v44  ;;  %v3147_v38 = vpop.f32.mrb[6].mxu0  ;;  %v2395_v16 = vadd.f32 %v3163_v13, %v4640_v39  ;;  %v2386_v56 = vpop.f32.mrb[7].mxu1 }
 0x1e4   : > { %v2436_v2 = vmax.f32 %v2328_v40, 0.0  ;;  %v2450_v45 = vmax.f32 %v2384_v10, 0.0  ;;  %v2331_v63 = vadd.f32 %v3147_v38, %v4640_v39  ;;  %v2322_v30 = vpop.f32.mrb[7].mxu0  ;;  %v2387_v49 = vadd.f32 %v4640_v39, %v2386_v56 }
 0x1e5   : > { %v3111_v55 = vpack.c.bf16 %v2452_v14, %v2452_v14  ;;  %v2434_v37 = vmax.f32 %v2320_v27, 0.0  ;;  %v2453_v1 = vmax.f32 %v2395_v16, 0.0  ;;  %v2323_v15 = vadd.f32 %v4640_v39, %v2322_v30 }
 0x1e6   : > { %v3095_v0 = vpack.c.bf16 %v2436_v2, %v2436_v2  ;;  %v3109_v58 = vpack.c.bf16 %v2450_v45, %v2450_v45  ;;  %v2437_v35 = vmax.f32 %v2331_v63, 0.0  ;;  %v2451_v41 = vmax.f32 %v2387_v49, 0.0 }
 0x1e7   : > { %2613 = vst.msk [vmem:[%s4651_s8 + $0x58] sm:$0xf] %vm2590_vm13, %v3111_v55  ;;  %v3093_v48 = vpack.c.bf16 %v2434_v37, %v2434_v37  ;;  %v3112_v25 = vpack.c.bf16 %v2453_v1, %v2453_v1  ;;  %v2435_v62 = vmax.f32 %v2323_v15, 0.0 }
 0x1e8   : > { %2597 = vst.msk [vmem:[%s4651_s8 + $0x18] sm:$0xf] %vm2590_vm13, %v3095_v0  ;;  %2611 = vst.msk [vmem:[%s4651_s8 + $0x50] sm:$0xf] %vm2590_vm13, %v3109_v58  ;;  %v3096_v46 = vpack.c.bf16 %v2437_v35, %v2437_v35  ;;  %v3110_v9 = vpack.c.bf16 %v2451_v41, %v2451_v41 }
 0x1e9   : > { %2595 = vst.msk [vmem:[%s4651_s8 + $0x10] sm:$0xf] %vm2590_vm13, %v3093_v48  ;;  %2614 = vst.msk [vmem:[%s4651_s8 + $0x5c] sm:$0xf] %vm2590_vm13, %v3112_v25  ;;  %v3094_v17 = vpack.c.bf16 %v2435_v62, %v2435_v62 }
 0x1ea   : > { %2598 = vst.msk [vmem:[%s4651_s8 + $0x1c] sm:$0xf] %vm2590_vm13, %v3096_v46  ;;  %2612 = vst.msk [vmem:[%s4651_s8 + $0x54] sm:$0xf] %vm2590_vm13, %v3110_v9 }
 0x1eb   : > { %2596 = vst.msk [vmem:[%s4651_s8 + $0x14] sm:$0xf] %vm2590_vm13, %v3094_v17 }
 0x220   : > { %v3166_v50 = vpop.f32.mrb[8].mxu1 }
 0x221   : > { %v3150_v32 = vpop.f32.mrb[8].mxu0  ;;  %v2408_v18 = vadd.f32 %v3166_v50, %v4640_v39  ;;  %v2399_v31 = vpop.f32.mrb[9].mxu1 }
 0x222   : > { %v2344_v42 = vadd.f32 %v3150_v32, %v4640_v39  ;;  %v2335_v4 = vpop.f32.mrb[9].mxu0  ;;  %v2400_v59 = vadd.f32 %v4640_v39, %v2399_v31  ;;  %v3167_v43 = vpop.f32.mrb[10].mxu1 }
 0x223   : > { %v2456_v52 = vmax.f32 %v2408_v18, 0.0  ;;  %v2336_v3 = vadd.f32 %v4640_v39, %v2335_v4  ;;  %v3151_v12 = vpop.f32.mrb[10].mxu0  ;;  %v2411_v34 = vadd.f32 %v3167_v43, %v4640_v39  ;;  %v2402_v6 = vpop.f32.mrb[11].mxu1 }
 0x224   : > { %v2440_v33 = vmax.f32 %v2344_v42, 0.0  ;;  %v2454_v11 = vmax.f32 %v2400_v59, 0.0  ;;  %v2347_v51 = vadd.f32 %v3151_v12, %v4640_v39  ;;  %v2338_v36 = vpop.f32.mrb[11].mxu0  ;;  %v2403_v54 = vadd.f32 %v4640_v39, %v2402_v6 }
 0x225   : > { %v3115_v21 = vpack.c.bf16 %v2456_v52, %v2456_v52  ;;  %v2438_v8 = vmax.f32 %v2336_v3, 0.0  ;;  %v2457_v53 = vmax.f32 %v2411_v34, 0.0  ;;  %v2339_v47 = vadd.f32 %v4640_v39, %v2338_v36 }
 0x226   : > { %v3099_v57 = vpack.c.bf16 %v2440_v33, %v2440_v33  ;;  %v3113_v61 = vpack.c.bf16 %v2454_v11, %v2454_v11  ;;  %v2441_v26 = vmax.f32 %v2347_v51, 0.0  ;;  %v2455_v23 = vmax.f32 %v2403_v54, 0.0 }
 0x227   : > { %2617 = vst.msk [vmem:[%s4651_s8 + $0x68] sm:$0xf] %vm2590_vm13, %v3115_v21  ;;  %v3097_v7 = vpack.c.bf16 %v2438_v8, %v2438_v8  ;;  %v3116_v19 = vpack.c.bf16 %v2457_v53, %v2457_v53  ;;  %v2439_v22 = vmax.f32 %v2339_v47, 0.0 }
 0x228   : > { %2601 = vst.msk [vmem:[%s4651_s8 + $0x28] sm:$0xf] %vm2590_vm13, %v3099_v57  ;;  %2615 = vst.msk [vmem:[%s4651_s8 + $0x60] sm:$0xf] %vm2590_vm13, %v3113_v61  ;;  %v3100_v29 = vpack.c.bf16 %v2441_v26, %v2441_v26  ;;  %v3114_v20 = vpack.c.bf16 %v2455_v23, %v2455_v23 }
 0x229   : > { %2599 = vst.msk [vmem:[%s4651_s8 + $0x20] sm:$0xf] %vm2590_vm13, %v3097_v7  ;;  %2618 = vst.msk [vmem:[%s4651_s8 + $0x6c] sm:$0xf] %vm2590_vm13, %v3116_v19  ;;  %v3098_v28 = vpack.c.bf16 %v2439_v22, %v2439_v22 }
 0x22a   : > { %2602 = vst.msk [vmem:[%s4651_s8 + $0x2c] sm:$0xf] %vm2590_vm13, %v3100_v29  ;;  %2616 = vst.msk [vmem:[%s4651_s8 + $0x64] sm:$0xf] %vm2590_vm13, %v3114_v20 }
 0x22b   : > { %2600 = vst.msk [vmem:[%s4651_s8 + $0x24] sm:$0xf] %vm2590_vm13, %v3098_v28 }
 0x25c   : > { %v3170_v60 = vpop.f32.mrb[12].mxu1 }
 0x25d   : > { %v3154_v5 = vpop.f32.mrb[12].mxu0  ;;  %v2424_v24 = vadd.f32 %v3170_v60, %v4640_v39  ;;  %v2415_v40 = vpop.f32.mrb[13].mxu1 }
 0x25e   : > { %v2360_v44 = vadd.f32 %v3154_v5, %v4640_v39  ;;  %v2351_v10 = vpop.f32.mrb[13].mxu0  ;;  %v2416_v13 = vadd.f32 %v4640_v39, %v2415_v40  ;;  %v3171_v14 = vpop.f32.mrb[14].mxu1 }
 0x25f   : > { %v2460_v27 = vmax.f32 %v2424_v24, 0.0  ;;  %v2352_v38 = vadd.f32 %v4640_v39, %v2351_v10  ;;  %v3155_v16 = vpop.f32.mrb[14].mxu0  ;;  %v2427_v56 = vadd.f32 %v3171_v14, %v4640_v39  ;;  %v2418_v2 = vpop.f32.mrb[15].mxu1 }
 0x260   : > { %v2444_v45 = vmax.f32 %v2360_v44, 0.0  ;;  %v2458_v63 = vmax.f32 %v2416_v13, 0.0  ;;  %v2363_v30 = vadd.f32 %v3155_v16, %v4640_v39  ;;  %v2354_v49 = vpop.f32.mrb[15].mxu0  ;;  %v2419_v55 = vadd.f32 %v4640_v39, %v2418_v2 }
 0x261   : > { %v3119_v37 = vpack.c.bf16 %v2460_v27, %v2460_v27  ;;  %v2442_v1 = vmax.f32 %v2352_v38, 0.0  ;;  %v2461_v15 = vmax.f32 %v2427_v56, 0.0  ;;  %v2355_v0 = vadd.f32 %v4640_v39, %v2354_v49 }
 0x262   : > { %v3103_v58 = vpack.c.bf16 %v2444_v45, %v2444_v45  ;;  %v3117_v35 = vpack.c.bf16 %v2458_v63, %v2458_v63  ;;  %v2445_v41 = vmax.f32 %v2363_v30, 0.0  ;;  %v2459_v48 = vmax.f32 %v2419_v55, 0.0 }
 0x263   : > { %2621 = vst.msk [vmem:[%s4651_s8 + $0x78] sm:$0xf] %vm2590_vm13, %v3119_v37  ;;  %v3101_v25 = vpack.c.bf16 %v2442_v1, %v2442_v1  ;;  %v3120_v62 = vpack.c.bf16 %v2461_v15, %v2461_v15  ;;  %v2443_v46 = vmax.f32 %v2355_v0, 0.0 }
 0x264   : > { %2605 = vst.msk [vmem:[%s4651_s8 + $0x38] sm:$0xf] %vm2590_vm13, %v3103_v58  ;;  %2619 = vst.msk [vmem:[%s4651_s8 + $0x70] sm:$0xf] %vm2590_vm13, %v3117_v35  ;;  %v3104_v9 = vpack.c.bf16 %v2445_v41, %v2445_v41  ;;  %v3118_v17 = vpack.c.bf16 %v2459_v48, %v2459_v48 }
 0x265   : > { %2603 = vst.msk [vmem:[%s4651_s8 + $0x30] sm:$0xf] %vm2590_vm13, %v3101_v25  ;;  %2622 = vst.msk [vmem:[%s4651_s8 + $0x7c] sm:$0xf] %vm2590_vm13, %v3120_v62  ;;  %v3102_v39 = vpack.c.bf16 %v2443_v46, %v2443_v46 }
 0x266   : > { %2606 = vst.msk [vmem:[%s4651_s8 + $0x3c] sm:$0xf] %vm2590_vm13, %v3104_v9  ;;  %2620 = vst.msk [vmem:[%s4651_s8 + $0x74] sm:$0xf] %vm2590_vm13, %v3118_v17 }
 0x267   : > { %2604 = vst.msk [vmem:[%s4651_s8 + $0x34] sm:$0xf] %vm2590_vm13, %v3102_v39 }
 0x268 PF: > { %s13_s14 = sadd.s32 1, %s3375_s14   ;;  %s4775_s12 = smov %s3371_s13 }
 0x269   : > { %p10_p5 = scmp.ge.s32.totalorder %s13_s14, 4   ;;  %s4776_s13 = smov %s4778_s15 }
 0x26b   :  { %12 = sbr.rel (!%p10_p5) target bundleno = 2 (0x2), region = 71 }

</bundles_post_ra>
